<compile_context>
chip_gen: v7x
topology: tpu7x:2x2x1
jax: 0.10.0
libtpu: 0.0.40
codegen_flags: <defaults>
</compile_context>

<pallas_src>
import jax
import jax.numpy as jnp
from jax.experimental import pallas as pl
from jax.experimental.pallas import tpu as pltpu

BN_EPS = 1e-5
# 48 MiB: leaves headroom on v7x (64 MiB physical per TensorCore) and is far below
# v5e/v6e's 128 MiB; these blocks are tiny anyway.
_VMEM_LIMIT = 48 << 20


# ----------------------------------------------------------------------------- stage 1
def _stage1_call(x_pad, wdw, wpw, *, k, stride, H1, W1):
    """ReLU + depthwise conv (k x k, stride) + pointwise 1x1 + per-image BN stats."""
    N, Hp, Wp, C = x_pad.shape
    C_mid = wpw.shape[1]
    s = stride

    def kernel(x_ref, wdw_ref, wpw_ref, y_ref, st_ref):
        # ReLU (zero-padding commutes with ReLU, so padding was done in the wrapper).
        x = jnp.maximum(x_ref[0].astype(jnp.float32), 0.0)           # (Hp, Wp, C)
        acc = jnp.zeros((H1, W1, C), jnp.float32)
        for tap in range(k * k):                                     # depthwise: k*k taps (VPU)
            dy, dx = tap // k, tap % k
            sl = x[dy: dy + s * (H1 - 1) + 1: s,
                   dx: dx + s * (W1 - 1) + 1: s, :]
            acc = acc + sl * wdw_ref[tap:tap + 1, :]                 # (1,C) broadcast
        y = jnp.dot(acc.reshape(H1 * W1, C), wpw_ref[...],
                    preferred_element_type=jnp.float32)              # pointwise (MXU)
        y_ref[0] = y.reshape(H1, W1, C_mid).astype(y_ref.dtype)
        st_ref[0] = jnp.concatenate(
            [jnp.sum(y, axis=0, keepdims=True),
             jnp.sum(y * y, axis=0, keepdims=True)], axis=0)         # f32 partial sums

    flops = N * (2 * H1 * W1 * C * k * k + 2 * H1 * W1 * C * C_mid)
    bytes_accessed = 4 * (x_pad.size + N * H1 * W1 * C_mid)
    return pl.pallas_call(
        kernel,
        out_shape=(jax.ShapeDtypeStruct((N, H1, W1, C_mid), jnp.float32),
                   jax.ShapeDtypeStruct((N, 2, C_mid), jnp.float32)),
        grid=(N,),
        in_specs=[pl.BlockSpec((1, Hp, Wp, C), lambda n: (n, 0, 0, 0)),
                  pl.BlockSpec((k * k, C), lambda n: (0, 0)),
                  pl.BlockSpec((C, C_mid), lambda n: (0, 0))],
        out_specs=(pl.BlockSpec((1, H1, W1, C_mid), lambda n: (n, 0, 0, 0)),
                   pl.BlockSpec((1, 2, C_mid), lambda n: (n, 0, 0))),
        compiler_params=pltpu.CompilerParams(
            dimension_semantics=("parallel",), vmem_limit_bytes=_VMEM_LIMIT),
        cost_estimate=pl.CostEstimate(flops=flops, transcendentals=0,
                                      bytes_accessed=bytes_accessed),
    )(x_pad, wdw, wpw)


# ----------------------------------------------------------------------------- stage 2
def _stage2_call(y1, scale1, shift1, wdw, wpw, *, k, pad):
    """BN1 apply (pre-folded) + ReLU + depthwise conv (stride 1) + pointwise + BN2 stats."""
    N, H1, W1, C = y1.shape
    C_out = wpw.shape[1]
    Hp, Wp = H1 + 2 * pad, W1 + 2 * pad
    H2, W2 = Hp - k + 1, Wp - k + 1

    def kernel(y1_ref, sc_ref, sh_ref, wdw_ref, wpw_ref, y2_ref, st_ref, zpad_ref):
        # BN1 (folded affine: one mul+add) + ReLU.
        z = jnp.maximum(y1_ref[0] * sc_ref[...] + sh_ref[...], 0.0)  # (H1, W1, C)
        # Zero-pad AFTER BN+ReLU (matches Conv2d padding its own input) via VMEM scratch.
        zpad_ref[...] = jnp.zeros((Hp, Wp, C), jnp.float32)
        zpad_ref[pad:pad + H1, pad:pad + W1, :] = z
        acc = jnp.zeros((H2, W2, C), jnp.float32)
        for tap in range(k * k):
            dy, dx = tap // k, tap % k
            acc = acc + zpad_ref[dy:dy + H2, dx:dx + W2, :] * wdw_ref[tap:tap + 1, :]
        y2 = jnp.dot(acc.reshape(H2 * W2, C), wpw_ref[...],
                     preferred_element_type=jnp.float32)
        y2_ref[0] = y2.reshape(H2, W2, C_out).astype(y2_ref.dtype)
        st_ref[0] = jnp.concatenate(
            [jnp.sum(y2, axis=0, keepdims=True),
             jnp.sum(y2 * y2, axis=0, keepdims=True)], axis=0)

    flops = N * (2 * H2 * W2 * C * k * k + 2 * H2 * W2 * C * C_out)
    bytes_accessed = 4 * (y1.size + N * H2 * W2 * C_out)
    return pl.pallas_call(
        kernel,
        out_shape=(jax.ShapeDtypeStruct((N, H2, W2, C_out), jnp.float32),
                   jax.ShapeDtypeStruct((N, 2, C_out), jnp.float32)),
        grid=(N,),
        in_specs=[pl.BlockSpec((1, H1, W1, C), lambda n: (n, 0, 0, 0)),
                  pl.BlockSpec((1, C), lambda n: (0, 0)),
                  pl.BlockSpec((1, C), lambda n: (0, 0)),
                  pl.BlockSpec((k * k, C), lambda n: (0, 0)),
                  pl.BlockSpec((C, C_out), lambda n: (0, 0))],
        out_specs=(pl.BlockSpec((1, H2, W2, C_out), lambda n: (n, 0, 0, 0)),
                   pl.BlockSpec((1, 2, C_out), lambda n: (n, 0, 0))),
        scratch_shapes=[pltpu.VMEM((Hp, Wp, C), jnp.float32)],
        compiler_params=pltpu.CompilerParams(
            dimension_semantics=("parallel",), vmem_limit_bytes=_VMEM_LIMIT),
        cost_estimate=pl.CostEstimate(flops=flops, transcendentals=0,
                                      bytes_accessed=bytes_accessed),
    )(y1, scale1, shift1, wdw, wpw)


# ----------------------------------------------------------------------------- stage 3
def _pick_tile(m):
    for t in (1024, 512, 256, 128, 64, 32, 16, 8):
        if t <= m and m % t == 0:
            return t
    return m


def _bn_apply_call(y_flat, scale, shift):
    """Final BN apply: out = y * scale + shift, tiled over rows for pipelining."""
    M, C = y_flat.shape
    tm = _pick_tile(M)
    if tm == M and M % 2 == 0 and (M // 2) % 8 == 0:
        tm = M // 2                                  # ensure >=2 grid steps => double-buffering

    def kernel(y_ref, sc_ref, sh_ref, o_ref):
        o_ref[...] = (y_ref[...] * sc_ref[...] + sh_ref[...]).astype(o_ref.dtype)

    return pl.pallas_call(
        kernel,
        out_shape=jax.ShapeDtypeStruct((M, C), jnp.float32),
        grid=(M // tm,),
        in_specs=[pl.BlockSpec((tm, C), lambda i: (i, 0)),
                  pl.BlockSpec((1, C), lambda i: (0, 0)),
                  pl.BlockSpec((1, C), lambda i: (0, 0))],
        out_specs=pl.BlockSpec((tm, C), lambda i: (i, 0)),
        compiler_params=pltpu.CompilerParams(
            dimension_semantics=("parallel",), vmem_limit_bytes=_VMEM_LIMIT),
    )(y_flat, scale, shift)


# ----------------------------------------------------------------------------- wrapper
def _fold_bn(stats_sum, m, gamma, beta):
    """From (sum, sum(y^2)) to pre-folded scale/shift: out = y*scale + shift."""
    mean = stats_sum[0] / m
    var = jnp.maximum(stats_sum[1] / m - mean * mean, 0.0)   # biased var (BN training mode)
    inv = jax.lax.rsqrt(var + BN_EPS)
    scale = gamma * inv
    shift = beta - mean * scale
    return scale.reshape(1, -1), shift.reshape(1, -1)


def sep_conv(x_nchw, w_dw1, w_pw1, g1, b1, w_dw2, w_pw2, g2, b2,
             *, kernel_size, stride, padding):
    """x: (N, C_in, H, W); w_dw*: (C, 1, k, k); w_pw*: (C_o, C_i, 1, 1); g*/b*: (C,)."""
    N, C_in, H, W = x_nchw.shape
    k, s, p = kernel_size, stride, padding
    C_mid = w_pw1.shape[0]
    C_out = w_pw2.shape[0]
    H1 = (H + 2 * p - k) // s + 1
    W1 = (W + 2 * p - k) // s + 1

    # NCHW -> NHWC (channels on the lane axis) + spatial zero-pad for conv 1.
    x_nhwc = jnp.transpose(x_nchw, (0, 2, 3, 1)).astype(jnp.float32)
    x_pad = jnp.pad(x_nhwc, ((0, 0), (p, p), (p, p), (0, 0)))

    wdw1 = w_dw1.reshape(C_in, k * k).T.astype(jnp.float32)       # (k*k, C_in)
    wpw1 = w_pw1.reshape(C_mid, C_in).T.astype(jnp.float32)       # (C_in, C_mid)
    wdw2 = w_dw2.reshape(C_mid, k * k).T.astype(jnp.float32)      # (k*k, C_mid)
    wpw2 = w_pw2.reshape(C_out, C_mid).T.astype(jnp.float32)      # (C_mid, C_out)

    # Stage 1 + global BN1 finalize (sums accumulated in-kernel, tiny reduce here).
    y1, st1 = _stage1_call(x_pad, wdw1, wpw1, k=k, stride=s, H1=H1, W1=W1)
    scale1, shift1 = _fold_bn(jnp.sum(st1, axis=0), N * H1 * W1,
                              g1.astype(jnp.float32), b1.astype(jnp.float32))

    # Stage 2 + global BN2 finalize.
    y2, st2 = _stage2_call(y1, scale1, shift1, wdw2, wpw2, k=k, pad=p)
    _, H2, W2, _ = y2.shape
    scale2, shift2 = _fold_bn(jnp.sum(st2, axis=0), N * H2 * W2,
                              g2.astype(jnp.float32), b2.astype(jnp.float32))

    # Stage 3: normalize, then back to NCHW.
    out_flat = _bn_apply_call(y2.reshape(N * H2 * W2, C_out), scale2, shift2)
    out = out_flat.reshape(N, H2, W2, C_out)
    return jnp.transpose(out, (0, 3, 1, 2))


# ----------------------------------------------------------------------------- reference
def _reference(x, w_dw1, w_pw1, g1, b1, w_dw2, w_pw2, g2, b2,
               *, kernel_size, stride, padding):
    """Pure-JAX f32 reference matching the PyTorch forward (training-mode BN)."""
    kk, p = kernel_size, padding

    def dw(y, w, s):
        N, C, H, W = y.shape
        yp = jnp.pad(y, ((0, 0), (0, 0), (p, p), (p, p)))
        Ho = (H + 2 * p - kk) // s + 1
        Wo = (W + 2 * p - kk) // s + 1
        out = jnp.zeros((N, C, Ho, Wo), jnp.float32)
        for dy in range(kk):
            for dx in range(kk):
                sl = yp[:, :, dy: dy + s * (Ho - 1) + 1: s,
                        dx: dx + s * (Wo - 1) + 1: s]
                out = out + sl * w[:, 0, dy, dx][None, :, None, None]
        return out

    def pw(y, w):
        return jnp.einsum("nchw,oc->nohw", y, w[:, :, 0, 0],
                          precision=jax.lax.Precision.HIGHEST)

    def bn(y, g, b):
        mean = jnp.mean(y, axis=(0, 2, 3), keepdims=True)
        var = jnp.mean((y - mean) ** 2, axis=(0, 2, 3), keepdims=True)
        yhat = (y - mean) * jax.lax.rsqrt(var + BN_EPS)
        return yhat * g[None, :, None, None] + b[None, :, None, None]

    y = jnp.maximum(x, 0.0)
    y = bn(pw(dw(y, w_dw1, stride), w_pw1), g1, b1)
    y = jnp.maximum(y, 0.0)
    y = bn(pw(dw(y, w_dw2, 1), w_pw2), g2, b2)
    return y


if __name__ == "__main__":
    # Small shapes consistent with the module: batch=2, C_in=4, 16x16 spatial, C_out=8,
    # kernel_size=3, stride=1, padding=1 (typical DARTS SepConv config).
    N, C_in, H, W = 2, 4, 16, 16
    C_out = 8
    k, s, p = 3, 1, 1

    key = jax.random.PRNGKey(0)
    kx, k1, k2, k3, k4 = jax.random.split(key, 5)
    x = jax.random.normal(kx, (N, C_in, H, W), dtype=jnp.float32)
    w_dw1 = 0.2 * jax.random.normal(k1, (C_in, 1, k, k), dtype=jnp.float32)
    w_pw1 = 0.2 * jax.random.normal(k2, (C_in, C_in, 1, 1), dtype=jnp.float32)
    w_dw2 = 0.2 * jax.random.normal(k3, (C_in, 1, k, k), dtype=jnp.float32)
    w_pw2 = 0.2 * jax.random.normal(k4, (C_out, C_in, 1, 1), dtype=jnp.float32)
    # BatchNorm2d default init: weight=1, bias=0.
    g1 = jnp.ones((C_in,), jnp.float32)
    b1 = jnp.zeros((C_in,), jnp.float32)
    g2 = jnp.ones((C_out,), jnp.float32)
    b2 = jnp.zeros((C_out,), jnp.float32)

    out = sep_conv(x, w_dw1, w_pw1, g1, b1, w_dw2, w_pw2, g2, b2,
                   kernel_size=k, stride=s, padding=p)
    out = jax.block_until_ready(out)

    ref = _reference(x, w_dw1, w_pw1, g1, b1, w_dw2, w_pw2, g2, b2,
                     kernel_size=k, stride=s, padding=p)
    assert out.shape == ref.shape == (N, C_out, H, W), (out.shape, ref.shape)
    max_err = float(jnp.max(jnp.abs(out - ref)))
    assert jnp.allclose(out, ref, atol=5e-4, rtol=5e-4), max_err

    print("KERNEL_OK")
</pallas_src>

<mosaic_0001>
module attributes {stable_mosaic.version = 11 : i64} {
  func.func @kernel(%arg0: i32, %arg1: memref<1x18x18x4xf32, #tpu.memory_space<vmem>>, %arg2: memref<9x4xf32, #tpu.memory_space<vmem>>, %arg3: memref<4x4xf32, #tpu.memory_space<vmem>>, %arg4: memref<1x16x16x4xf32, #tpu.memory_space<vmem>>, %arg5: memref<1x2x4xf32, #tpu.memory_space<vmem>>) attributes {dimension_semantics = [#tpu.dimension_semantics<parallel>], iteration_bounds = array<i64: 2>, scalar_prefetch = 0 : i64, scratch_operands = 0 : i64, tpu.core_type = #tpu.core_type<tc>, window_params = [{transform_indices = @transform_0, window_bounds = array<i64: 1, 18, 18, 4>}, {pipeline_mode = #tpu.pipeline_mode<synchronous>, transform_indices = @transform_1, window_bounds = array<i64: 9, 4>}, {pipeline_mode = #tpu.pipeline_mode<synchronous>, transform_indices = @transform_2, window_bounds = array<i64: 4, 4>}, {transform_indices = @transform_3, window_bounds = array<i64: 1, 16, 16, 4>}, {transform_indices = @transform_4, window_bounds = array<i64: 1, 2, 4>}]} {
    %c0 = arith.constant 0 : index
    %c0_0 = arith.constant 0 : index
    %c0_1 = arith.constant 0 : index
    %c0_2 = arith.constant 0 : index
    %0 = vector.load %arg1[%c0, %c0_0, %c0_1, %c0_2] : memref<1x18x18x4xf32, #tpu.memory_space<vmem>>, vector<1x18x18x4xf32>
    %1 = vector.shape_cast %0 : vector<1x18x18x4xf32> to vector<18x18x4xf32>
    %cst = arith.constant 0.000000e+00 : f32
    %2 = vector.broadcast %cst : f32 to vector<18x18x4xf32>
    %3 = arith.maximumf %1, %2 : vector<18x18x4xf32>
    %cst_3 = arith.constant 0.000000e+00 : f32
    %4 = vector.broadcast %cst_3 : f32 to vector<16x16x4xf32>
    %5 = vector.extract_strided_slice %3 {offsets = [0, 0, 0], sizes = [16, 16, 4], strides = [1, 1, 1]} : vector<18x18x4xf32> to vector<16x16x4xf32>
    %c0_4 = arith.constant 0 : index
    %c0_5 = arith.constant 0 : index
    %6 = vector.load %arg2[%c0_4, %c0_5] : memref<9x4xf32, #tpu.memory_space<vmem>>, vector<1x4xf32>
    %7 = vector.shape_cast %6 : vector<1x4xf32> to vector<1x1x4xf32>
    %8 = vector.broadcast %7 : vector<1x1x4xf32> to vector<16x16x4xf32>
    %9 = arith.mulf %5, %8 : vector<16x16x4xf32>
    %10 = arith.addf %4, %9 : vector<16x16x4xf32>
    %11 = vector.extract_strided_slice %3 {offsets = [0, 1, 0], sizes = [16, 16, 4], strides = [1, 1, 1]} : vector<18x18x4xf32> to vector<16x16x4xf32>
    %c1 = arith.constant 1 : index
    %c0_6 = arith.constant 0 : index
    %12 = vector.load %arg2[%c1, %c0_6] : memref<9x4xf32, #tpu.memory_space<vmem>>, vector<1x4xf32>
    %13 = vector.shape_cast %12 : vector<1x4xf32> to vector<1x1x4xf32>
    %14 = vector.broadcast %13 : vector<1x1x4xf32> to vector<16x16x4xf32>
    %15 = arith.mulf %11, %14 : vector<16x16x4xf32>
    %16 = arith.addf %10, %15 : vector<16x16x4xf32>
    %17 = vector.extract_strided_slice %3 {offsets = [0, 2, 0], sizes = [16, 16, 4], strides = [1, 1, 1]} : vector<18x18x4xf32> to vector<16x16x4xf32>
    %c2 = arith.constant 2 : index
    %c0_7 = arith.constant 0 : index
    %18 = vector.load %arg2[%c2, %c0_7] : memref<9x4xf32, #tpu.memory_space<vmem>>, vector<1x4xf32>
    %19 = vector.shape_cast %18 : vector<1x4xf32> to vector<1x1x4xf32>
    %20 = vector.broadcast %19 : vector<1x1x4xf32> to vector<16x16x4xf32>
    %21 = arith.mulf %17, %20 : vector<16x16x4xf32>
    %22 = arith.addf %16, %21 : vector<16x16x4xf32>
    %23 = vector.extract_strided_slice %3 {offsets = [1, 0, 0], sizes = [16, 16, 4], strides = [1, 1, 1]} : vector<18x18x4xf32> to vector<16x16x4xf32>
    %c3 = arith.constant 3 : index
    %c0_8 = arith.constant 0 : index
    %24 = vector.load %arg2[%c3, %c0_8] : memref<9x4xf32, #tpu.memory_space<vmem>>, vector<1x4xf32>
    %25 = vector.shape_cast %24 : vector<1x4xf32> to vector<1x1x4xf32>
    %26 = vector.broadcast %25 : vector<1x1x4xf32> to vector<16x16x4xf32>
    %27 = arith.mulf %23, %26 : vector<16x16x4xf32>
    %28 = arith.addf %22, %27 : vector<16x16x4xf32>
    %29 = vector.extract_strided_slice %3 {offsets = [1, 1, 0], sizes = [16, 16, 4], strides = [1, 1, 1]} : vector<18x18x4xf32> to vector<16x16x4xf32>
    %c4 = arith.constant 4 : index
    %c0_9 = arith.constant 0 : index
    %30 = vector.load %arg2[%c4, %c0_9] : memref<9x4xf32, #tpu.memory_space<vmem>>, vector<1x4xf32>
    %31 = vector.shape_cast %30 : vector<1x4xf32> to vector<1x1x4xf32>
    %32 = vector.broadcast %31 : vector<1x1x4xf32> to vector<16x16x4xf32>
    %33 = arith.mulf %29, %32 : vector<16x16x4xf32>
    %34 = arith.addf %28, %33 : vector<16x16x4xf32>
    %35 = vector.extract_strided_slice %3 {offsets = [1, 2, 0], sizes = [16, 16, 4], strides = [1, 1, 1]} : vector<18x18x4xf32> to vector<16x16x4xf32>
    %c5 = arith.constant 5 : index
    %c0_10 = arith.constant 0 : index
    %36 = vector.load %arg2[%c5, %c0_10] : memref<9x4xf32, #tpu.memory_space<vmem>>, vector<1x4xf32>
    %37 = vector.shape_cast %36 : vector<1x4xf32> to vector<1x1x4xf32>
    %38 = vector.broadcast %37 : vector<1x1x4xf32> to vector<16x16x4xf32>
    %39 = arith.mulf %35, %38 : vector<16x16x4xf32>
    %40 = arith.addf %34, %39 : vector<16x16x4xf32>
    %41 = vector.extract_strided_slice %3 {offsets = [2, 0, 0], sizes = [16, 16, 4], strides = [1, 1, 1]} : vector<18x18x4xf32> to vector<16x16x4xf32>
    %c6 = arith.constant 6 : index
    %c0_11 = arith.constant 0 : index
    %42 = vector.load %arg2[%c6, %c0_11] : memref<9x4xf32, #tpu.memory_space<vmem>>, vector<1x4xf32>
    %43 = vector.shape_cast %42 : vector<1x4xf32> to vector<1x1x4xf32>
    %44 = vector.broadcast %43 : vector<1x1x4xf32> to vector<16x16x4xf32>
    %45 = arith.mulf %41, %44 : vector<16x16x4xf32>
    %46 = arith.addf %40, %45 : vector<16x16x4xf32>
    %47 = vector.extract_strided_slice %3 {offsets = [2, 1, 0], sizes = [16, 16, 4], strides = [1, 1, 1]} : vector<18x18x4xf32> to vector<16x16x4xf32>
    %c7 = arith.constant 7 : index
    %c0_12 = arith.constant 0 : index
    %48 = vector.load %arg2[%c7, %c0_12] : memref<9x4xf32, #tpu.memory_space<vmem>>, vector<1x4xf32>
    %49 = vector.shape_cast %48 : vector<1x4xf32> to vector<1x1x4xf32>
    %50 = vector.broadcast %49 : vector<1x1x4xf32> to vector<16x16x4xf32>
    %51 = arith.mulf %47, %50 : vector<16x16x4xf32>
    %52 = arith.addf %46, %51 : vector<16x16x4xf32>
    %53 = vector.extract_strided_slice %3 {offsets = [2, 2, 0], sizes = [16, 16, 4], strides = [1, 1, 1]} : vector<18x18x4xf32> to vector<16x16x4xf32>
    %c8 = arith.constant 8 : index
    %c0_13 = arith.constant 0 : index
    %54 = vector.load %arg2[%c8, %c0_13] : memref<9x4xf32, #tpu.memory_space<vmem>>, vector<1x4xf32>
    %55 = vector.shape_cast %54 : vector<1x4xf32> to vector<1x1x4xf32>
    %56 = vector.broadcast %55 : vector<1x1x4xf32> to vector<16x16x4xf32>
    %57 = arith.mulf %53, %56 : vector<16x16x4xf32>
    %58 = arith.addf %52, %57 : vector<16x16x4xf32>
    %59 = vector.shape_cast %58 : vector<16x16x4xf32> to vector<256x4xf32>
    %c0_14 = arith.constant 0 : index
    %c0_15 = arith.constant 0 : index
    %60 = vector.load %arg3[%c0_14, %c0_15] : memref<4x4xf32, #tpu.memory_space<vmem>>, vector<4x4xf32>
    %cst_16 = arith.constant dense<0.000000e+00> : vector<256x4xf32>
    %61 = tpu.matmul %59, %60, %cst_16 {dimension_numbers = #tpu.dot_dimension_numbers<[1], [0], [0], [1], [0, 0, 1, 1], [], []>} : vector<256x4xf32>, vector<4x4xf32>, vector<256x4xf32> -> vector<256x4xf32>
    %62 = vector.shape_cast %61 : vector<256x4xf32> to vector<16x16x4xf32>
    %c0_17 = arith.constant 0 : index
    %c0_18 = arith.constant 0 : index
    %c0_19 = arith.constant 0 : index
    %c0_20 = arith.constant 0 : index
    %63 = vector.load %arg4[%c0_17, %c0_18, %c0_19, %c0_20] : memref<1x16x16x4xf32, #tpu.memory_space<vmem>>, vector<1x16x16x4xf32>
    %64 = vector.shape_cast %63 : vector<1x16x16x4xf32> to vector<16x16x4xf32>
    %65 = vector.shape_cast %62 : vector<16x16x4xf32> to vector<1x16x16x4xf32>
    tpu.vector_store %arg4[%c0_17, %c0_18, %c0_19, %c0_20], %65 {strides = array<i32>} : memref<1x16x16x4xf32, #tpu.memory_space<vmem>>, vector<1x16x16x4xf32>,
    %cst_21 = arith.constant dense<0.000000e+00> : vector<4xf32>
    %66 = vector.multi_reduction <add>, %61, %cst_21 [0] : vector<256x4xf32> to vector<4xf32>
    %67 = vector.shape_cast %66 : vector<4xf32> to vector<1x4xf32>
    %68 = arith.mulf %61, %61 : vector<256x4xf32>
    %cst_22 = arith.constant dense<0.000000e+00> : vector<4xf32>
    %69 = vector.multi_reduction <add>, %68, %cst_22 [0] : vector<256x4xf32> to vector<4xf32>
    %70 = vector.shape_cast %69 : vector<4xf32> to vector<1x4xf32>
    %71 = tpu.concatenate %67, %70 in 0 : vector<1x4xf32>, vector<1x4xf32> -> vector<2x4xf32>
    %c0_23 = arith.constant 0 : index
    %c0_24 = arith.constant 0 : index
    %c0_25 = arith.constant 0 : index
    %72 = vector.load %arg5[%c0_23, %c0_24, %c0_25] : memref<1x2x4xf32, #tpu.memory_space<vmem>>, vector<1x2x4xf32>
    %73 = vector.shape_cast %72 : vector<1x2x4xf32> to vector<2x4xf32>
    %74 = vector.shape_cast %71 : vector<2x4xf32> to vector<1x2x4xf32>
    tpu.vector_store %arg5[%c0_23, %c0_24, %c0_25], %74 {strides = array<i32>} : memref<1x2x4xf32, #tpu.memory_space<vmem>>, vector<1x2x4xf32>,
    return
  }
  func.func @transform_0(%arg0: i32) -> (i32, i32, i32, i32) {
    %c0_i32 = arith.constant 0 : i32
    %c0_i32_0 = arith.constant 0 : i32
    %c0_i32_1 = arith.constant 0 : i32
    %c0_i32_2 = arith.constant 0 : i32
    return %arg0, %c0_i32, %c0_i32_0, %c0_i32_1 : i32, i32, i32, i32
  }
  func.func @transform_1(%arg0: i32) -> (i32, i32) {
    %c0_i32 = arith.constant 0 : i32
    %c0_i32_0 = arith.constant 0 : i32
    %c0_i32_1 = arith.constant 0 : i32
    return %c0_i32, %c0_i32_0 : i32, i32
  }
  func.func @transform_2(%arg0: i32) -> (i32, i32) {
    %c0_i32 = arith.constant 0 : i32
    %c0_i32_0 = arith.constant 0 : i32
    %c0_i32_1 = arith.constant 0 : i32
    return %c0_i32, %c0_i32_0 : i32, i32
  }
  func.func @transform_3(%arg0: i32) -> (i32, i32, i32, i32) {
    %c0_i32 = arith.constant 0 : i32
    %c0_i32_0 = arith.constant 0 : i32
    %c0_i32_1 = arith.constant 0 : i32
    %c0_i32_2 = arith.constant 0 : i32
    return %arg0, %c0_i32, %c0_i32_0, %c0_i32_1 : i32, i32, i32, i32
  }
  func.func @transform_4(%arg0: i32) -> (i32, i32, i32) {
    %c0_i32 = arith.constant 0 : i32
    %c0_i32_0 = arith.constant 0 : i32
    %c0_i32_1 = arith.constant 0 : i32
    return %arg0, %c0_i32, %c0_i32_0 : i32, i32, i32
  }
}

</mosaic_0001>

<bundles_post_ra>
// kernel: tpu_custom_call.1
= control target key start
LH: loop header
LB: loop body
LE: loop exit
PB: predicated region body
PF: predicated region fallthrough
CT: control target
= control target key end

     0   :  { %10 = vsyncpa [#allocation3], 0  ;;  %s4647_s0 = inlined_call_operand.vmem [shape: f32[2,18,18,4], index: 0, kind: input, shape index: {}]   ;;  %s4648_s1 = inlined_call_operand.vmem [shape: f32[9,4], index: 1, kind: input, shape index: {}]   ;;  %s4649_s2 = inlined_call_operand.vmem [shape: f32[4,4], index: 2, kind: input, shape index: {}]   ;;  %s4650_s3 = inlined_call_operand.vmem [shape: f32[2,16,16,4], index: 3, kind: output, shape index: {0}]   ;;  %s4651_s4 = inlined_call_operand.hbm [shape: f32[2,2,4], index: 4, kind: output, shape index: {1}]  }
   0x1   :  { %12 = vsyncpa [#allocation3 + $0x1], 0  ;;  %s2923_s15 = smov 0   ;;  %s2925_s16 = smov 0  }
   0x2   :  { %s2927_s17 = smov 0   ;;  %s2929_s18 = smov 0  }
   0x3 LB: > { %s2944_s19 = sadd.s32 4294967295, %s2895_s18   ;;  %s2635_s20 = sadd.s32 4294967294, %s2895_s18   ;;  %s2895_s18 = sphi %s2929_s18, %s4657_s18   ;;  %s2891_s17 = sphi %s2927_s17, %s4656_s17   ;;  %s2887_s16 = sphi %s2925_s16, %s4655_s16   ;;  %s2883_s15 = sphi %s2923_s15, %s4654_s15  }
   0x4   : > { %s2948_s21 = sadd.s32 1, %s2895_s18   ;;  %s119_s22 = sadd.s32 1, %s2891_s17 }
   0x5   : > { %s116_s23 = ssub.s32 %s2895_s18, %s2948_s21  ;;  %p129_p0 = scmp.ne.s32.totalorder %s2891_s17, %s2887_s16 }
   0x6   : > { %p117_p1 = scmp.eq.s32.totalorder %s116_s23, 0  ;;  %p130_p2 = scmp.eq.s32.totalorder %s2944_s19, 1 }
   0x7   : > { %p135_p3 = scmp.ne.s32.totalorder %s2887_s16, %s2883_s15  ;;  %p136_p4 = scmp.eq.s32.totalorder %s2635_s20, 1 }
   0x8   : > { %s2959_s24 = scalar_select %p117_p1, %s2891_s17, %s119_s22  }
   0x9   : > { %p2961_p5 = por %p130_p2, %p129_p0  ;;  %p2965_p6 = por %p136_p4, %p135_p3 }
   0xa   : > { %p2638_p7 = scmp.ge.s32.totalorder %s2895_s18, 1  ;;  %p168_p8 = scmp.lt.s32.totalorder %s2895_s18, 3 }
   0xc   : > { %p169_p9 = pnand %p2638_p7, %p168_p8 }
   0xd   : > { %v1996_v0 = vld [vmem:[%s4649_s2] sm:$0xf] (!%p169_p9)  ;;  %vm2094_vm0 = vcmask (!%p169_p9), 1043456   ;;  %p199_p10 = scmp.lt.s32.totalorder (!%p169_p9), %s2944_s19, 1  ;;  %v3007_v11 = vld [vmem:[%s4648_s1 + $0x4] ss:$0 sm:$0xff] (!%p169_p9) }
   0xe   : > { %172 = sbr.rel (%p169_p9) target bundleno = 579 (0x243), region = 32  ;;  %2723 = vmatprep.subr.msk.mxu0 (!%p169_p9), %vm2094_vm0, %v1996_v0  ;;  %2773 = vmatprep.subr.msk.mxu1 (!%p169_p9), %vm2094_vm0, %v1996_v0  ;;  %v2987_v1 = vld [vmem:[%s4648_s1] ss:$0 sm:$0xff] (!%p169_p9)  ;;  %v2992_v2 = vld [vmem:[%s4648_s1 + $0x1] ss:$0 sm:$0xff] (!%p169_p9)  ;;  %vm487_vm1 = vcmask (!%p169_p9), 1046528  }
   0xf   : > { %2724 = vmatpush3.msk.msra.mxu0 (!%p169_p9), %vm2094_vm0, %v1996_v0  ;;  %2774 = vmatpush3.msk.msra.mxu1 (!%p169_p9), %vm2094_vm0, %v1996_v0  ;;  %v2997_v3 = vld [vmem:[%s4648_s1 + $0x2] ss:$0 sm:$0xff] (!%p169_p9)  ;;  %vm733_vm2 = vcmask (!%p169_p9), 1045504   ;;  %v3016_v14 = vld [vmem:[%s4648_s1 + $0x5] ss:$0 sm:$0xff] (!%p169_p9)  ;;  %vm1997_vm3 = vcmask (!%p169_p9), 31744  }
  0x10   : > { %v3029_v22 = vld [vmem:[%s4648_s1 + $0x3] ss:$0 sm:$0xff] (!%p169_p9)  ;;  %v3040_v25 = vld [vmem:[%s4648_s1 + $0x7] ss:$0 sm:$0xff] (!%p169_p9)  ;;  %v3050_v34 = vld [vmem:[%s4648_s1 + $0x8] ss:$0 sm:$0xff] (!%p169_p9) }
  0x11   : > { %v3060_v38 = vld [vmem:[%s4648_s1 + $0x6] ss:$0 sm:$0xff] (!%p169_p9)  ;;  %vm2525_vm4 = vcmask (!%p169_p9), 1040384   ;;  %vm2527_vm5 = vcmask (!%p169_p9), 25600   ;;  %s2897_s12 = smov (!%p169_p9), [#allocation2]  }
  0x12   : > { %s2837_s13 = sshll.u32 (!%p169_p9), %s2897_s12, 4  ;;  %s2838_s13 = int_to_ptr.vmem [resolvable:$false] %s2837_s13 }
  0x15   : > { %s2976_s29 = scalar_select %p199_p10, %s2944_s19, 1 }
  0x17   : > { %s2775_s30 = smul.u32 432, %s2976_s29  ;;  %s2689_s14 = sshll.u32 %s2976_s29, 8 }
  0x18   : > { %s4149_s22 = scalar_lea.vmem %s4650_s3, %s2689_s14  ;;  %s2839_s14 = scalar_lea.vmem %s2838_s13, 64 }
  0x19   : > { %s2982_s7 = scalar_lea.vmem %s4647_s0, %s2775_s30  ;;  %s2686_s30 = sshll.u32 %s2944_s19, 5 }
  0x1a   : > { %v209_v4 = vld [vmem:[%s2982_s7] sm:$0xff]  ;;  %v210_v5 = vld [vmem:[%s2982_s7 + $0x8] sm:$0xff]  ;;  %v212_v6 = vld [vmem:[%s2982_s7 + $0x18] sm:$0xff]  ;;  %s4605_s10 = scalar_lea.hbm %s4651_s4, %s2686_s30 }
  0x1b   : > { %v213_v7 = vld [vmem:[%s2982_s7 + $0x20] sm:$0xff]  ;;  %v215_v8 = vld [vmem:[%s2982_s7 + $0x30] sm:$0xff]  ;;  %v263_v9 = vmax.f32 %v209_v4, 0.0  ;;  %v264_v10 = vmax.f32 %v210_v5, 0.0  ;;  %v3009_v12 = vmax.f32 %v212_v6, 0.0  ;;  %v216_v19 = vld [vmem:[%s2982_s7 + $0x38] sm:$0xff] }
  0x1c   : > { %v3011_v13 = vmax.f32 %v213_v7, 0.0  ;;  %v3018_v15 = vmax.f32 %v215_v8, 0.0  ;;  %v3052_v35 = vmax.f32 %v216_v19, 0.0  ;;  %v211_v40 = vld [vmem:[%s2982_s7 + $0x10] sm:$0x3] }
  0x1d   : > { %v391_v16 = vmul.f32 %v2992_v2, %v263_v9  ;;  %v392_v17 = vmul.f32 %v2992_v2, %v264_v10  ;;  %v637_v18 = vmul.f32 %v2997_v3, %v263_v9  ;;  %v322_v20 = vmul.f32 %v2987_v1, %v263_v9  ;;  %v214_v45 = vld [vmem:[%s2982_s7 + $0x28] sm:$0x3]  ;;  %v217_v53 = vld [vmem:[%s2982_s7 + $0x40] sm:$0x3] }
  0x1e   : > { %v638_v21 = vmul.f32 %v2997_v3, %v264_v10  ;;  %v952_v23 = vmul.f32 %v3007_v11, %v3009_v12  ;;  %v3035_v24 = vmul.f32 %v3007_v11, %v3011_v13  ;;  %v1197_v29 = vmul.f32 %v3016_v14, %v3009_v12 }
  0x1f   : > { %v488_v26 = vrot.slane %v391_v16, 1  ;;  %v489_v27 = vrot.slane %v392_v17, 1  ;;  %v734_v28 = vrot.slane %v637_v18, 2  ;;  %v1198_v33 = vmul.f32 %v3016_v14, %v3011_v13 }
  0x20   : > { %v735_v30 = vrot.slane %v638_v21, 2  ;;  %v1048_v31 = vrot.slane %v952_v23, 1  ;;  %v1049_v32 = vrot.slane %v3035_v24, 1  ;;  %v883_v37 = vmul.f32 %v3029_v22, %v3009_v12  ;;  %v218_v24 = vld [vmem:[%s2982_s7 + $0x48] sm:$0xff] }
  0x21   : > { %v490_v36 = vsel %vm487_vm1, %v488_v26, %v489_v27  ;;  %v1511_v39 = vmul.f32 %v3040_v25, %v3018_v15  ;;  %v1293_v43 = vrot.slane %v1197_v29, 2  ;;  %v1294_v44 = vrot.slane %v1198_v33, 2  ;;  %v219_v26 = vld [vmem:[%s2982_s7 + $0x50] sm:$0xff] }
  0x22   : > { %v600_v41 = vadd.f32 %v490_v36, %v322_v20  ;;  %v736_v42 = vsel %vm733_vm2, %v734_v28, %v735_v30  ;;  %v1512_v46 = vmul.f32 %v3040_v25, %v3052_v35  ;;  %v1756_v48 = vmul.f32 %v3050_v34, %v3018_v15 }
  0x23   : > { %v1607_v47 = vrot.slane %v1511_v39, 1  ;;  %v3073_v49 = vmul.f32 %v3050_v34, %v3052_v35  ;;  %v1050_v51 = vsel %vm487_vm1, %v1048_v31, %v1049_v32  ;;  %v1442_v52 = vmul.f32 %v3060_v38, %v3018_v15 }
  0x24   : > { %v846_v50 = vadd.f32 %v736_v42, %v600_v41  ;;  %v265_v54 = vmax.f32 %v211_v40, 0.0  ;;  %v1608_v55 = vrot.slane %v1512_v46, 1  ;;  %v1852_v56 = vrot.slane %v1756_v48, 2 }
  0x25   : > { %v1853_v57 = vrot.slane %v3073_v49, 2  ;;  %v3080_v58 = vmax.f32 %v214_v45, 0.0  ;;  %v1295_v60 = vsel %vm733_vm2, %v1293_v43, %v1294_v44  ;;  %v3086_v0 = vmax.f32 %v217_v53, 0.0 }
  0x26   : > { %v915_v59 = vadd.f32 %v883_v37, %v846_v50  ;;  %v393_v61 = vmul.f32 %v2992_v2, %v265_v54  ;;  %v639_v62 = vmul.f32 %v2997_v3, %v265_v54  ;;  %v1609_v63 = vsel %vm487_vm1, %v1607_v47, %v1608_v55 }
  0x27   : > { %v323_v4 = vmul.f32 %v2987_v1, %v264_v10  ;;  %v954_v5 = vmul.f32 %v3007_v11, %v3080_v58  ;;  %v1199_v9 = vmul.f32 %v3016_v14, %v3080_v58  ;;  %v1854_v16 = vsel %vm733_vm2, %v1852_v56, %v1853_v57 }
  0x28   : > { %v1160_v6 = vadd.f32 %v1050_v51, %v915_v59  ;;  %v491_v7 = vrot.slane %v393_v61, 1  ;;  %v737_v8 = vrot.slane %v639_v62, 2  ;;  %v1513_v18 = vmul.f32 %v3040_v25, %v3086_v0 }
  0x29   : > { %v1051_v17 = vrot.slane %v954_v5, 1  ;;  %v1758_v10 = vmul.f32 %v3050_v34, %v3086_v0  ;;  %v1296_v23 = vrot.slane %v1199_v9, 2  ;;  %v884_v29 = vmul.f32 %v3029_v22, %v3011_v13 }
  0x2a   : > { %v1405_v19 = vadd.f32 %v1295_v60, %v1160_v6  ;;  %v492_v20 = vsel %vm487_vm1, %v489_v27, %v491_v7  ;;  %v738_v21 = vsel %vm733_vm2, %v735_v30, %v737_v8  ;;  %v1443_v31 = vmul.f32 %v3060_v38, %v3052_v35 }
  0x2b   : > { %v601_v28 = vadd.f32 %v492_v20, %v323_v4  ;;  %v1610_v33 = vrot.slane %v1513_v18, 1  ;;  %v1052_v37 = vsel %vm487_vm1, %v1049_v32, %v1051_v17  ;;  %v1297_v39 = vsel %vm733_vm2, %v1294_v44, %v1296_v23 }
  0x2c   : > { %v1474_v36 = vadd.f32 %v1442_v52, %v1405_v19  ;;  %v1855_v40 = vrot.slane %v1758_v10, 2  ;;  %v3111_v41 = vmax.f32 %v218_v24, 0.0  ;;  %v3113_v42 = vmax.f32 %v219_v26, 0.0 }
  0x2d   : > { %v847_v27 = vadd.f32 %v738_v21, %v601_v28  ;;  %v1611_v30 = vsel %vm487_vm1, %v1608_v55, %v1610_v33  ;;  %v394_v45 = vmul.f32 %v2992_v2, %v3009_v12  ;;  %v395_v46 = vmul.f32 %v2992_v2, %v3011_v13  ;;  %v220_v21 = vld [vmem:[%s2982_s7 + $0x58] sm:$0x3] }
  0x2e   : > { %v1719_v43 = vadd.f32 %v1609_v63, %v1474_v36  ;;  %v640_v32 = vmul.f32 %v2997_v3, %v3009_v12  ;;  %v324_v44 = vmul.f32 %v2987_v1, %v3009_v12  ;;  %v3125_v48 = vmul.f32 %v2997_v3, %v3011_v13 }
  0x2f   : > { %v916_v47 = vadd.f32 %v884_v29, %v847_v27  ;;  %v955_v50 = vmul.f32 %v3007_v11, %v3018_v15  ;;  %v493_v52 = vrot.slane %v394_v45, 1  ;;  %v494_v53 = vrot.slane %v395_v46, 1 }
  0x30   : > { %v1964_v51 = vadd.f32 %v1854_v16, %v1719_v43  ;;  %v739_v54 = vrot.slane %v640_v32, 2  ;;  %v740_v56 = vrot.slane %v3125_v48, 2  ;;  %v885_v59 = vmul.f32 %v3029_v22, %v3018_v15 }
  0x31   : > { %v1161_v55 = vadd.f32 %v1052_v37, %v916_v47  ;;  %v956_v12 = vmul.f32 %v3007_v11, %v3052_v35  ;;  %v495_v60 = vsel %vm487_vm1, %v493_v52, %v494_v53  ;;  %v1053_v61 = vrot.slane %v955_v50, 1 }
  0x32   : > { %2725 = vmatprep.mubr.msk.f32.mxu0 %vm1997_vm3, %v1964_v51  ;;  %v1200_v62 = vmul.f32 %v3016_v14, %v3018_v15  ;;  %v1201_v63 = vmul.f32 %v3016_v14, %v3052_v35  ;;  %v602_v5 = vadd.f32 %v495_v60, %v324_v44  ;;  %v741_v6 = vsel %vm733_vm2, %v739_v54, %v740_v56 }
  0x33   : > { %v1406_v4 = vadd.f32 %v1297_v39, %v1161_v55  ;;  %v1054_v7 = vrot.slane %v956_v12, 1  ;;  %v1514_v16 = vmul.f32 %v3040_v25, %v3111_v41  ;;  %v3145_v17 = vmul.f32 %v3040_v25, %v3113_v42  ;;  %v221_v55 = vld [vmem:[%s2982_s7 + $0x60] sm:$0xff] }
  0x34   : > { %v1298_v8 = vrot.slane %v1200_v62, 2  ;;  %v1299_v9 = vrot.slane %v1201_v63, 2  ;;  %v1856_v10 = vsel %vm733_vm2, %v1853_v57, %v1855_v40  ;;  %v848_v19 = vadd.f32 %v741_v6, %v602_v5  ;;  %v222_v62 = vld [vmem:[%s2982_s7 + $0x68] sm:$0xff] }
  0x35   : > { %v1475_v18 = vadd.f32 %v1443_v31, %v1406_v4  ;;  %v1759_v20 = vmul.f32 %v3050_v34, %v3111_v41  ;;  %v1055_v23 = vsel %vm487_vm1, %v1053_v61, %v1054_v7  ;;  %v1612_v24 = vrot.slane %v1514_v16, 1 }
  0x36   : > { %v1613_v26 = vrot.slane %v3145_v17, 1  ;;  %v3157_v28 = vmul.f32 %v3050_v34, %v3113_v42  ;;  %v917_v31 = vadd.f32 %v885_v59, %v848_v19  ;;  %v1300_v49 = vsel %vm733_vm2, %v1298_v8, %v1299_v9 }
  0x37   : > { %v1720_v29 = vadd.f32 %v1611_v30, %v1475_v18  ;;  %v1444_v57 = vmul.f32 %v3060_v38, %v3111_v41  ;;  %v1857_v33 = vrot.slane %v1759_v20, 2  ;;  %v3163_v37 = vmax.f32 %v220_v21, 0.0 }
  0x38   : > { %v1858_v36 = vrot.slane %v3157_v28, 2  ;;  %v396_v39 = vmul.f32 %v2992_v2, %v3080_v58  ;;  %v1162_v27 = vadd.f32 %v1055_v23, %v917_v31  ;;  %v325_v30 = vmul.f32 %v2987_v1, %v3011_v13 }
  0x39   : > { %v1965_v40 = vadd.f32 %v1856_v10, %v1720_v29  ;;  %v642_v43 = vmul.f32 %v2997_v3, %v3080_v58  ;;  %v1614_v45 = vsel %vm487_vm1, %v1612_v24, %v1613_v26  ;;  %v957_v32 = vmul.f32 %v3007_v11, %v3086_v0 }
  0x3a   : > { %v496_v46 = vrot.slane %v396_v39, 1  ;;  %v1202_v47 = vmul.f32 %v3016_v14, %v3086_v0  ;;  %v1407_v44 = vadd.f32 %v1300_v49, %v1162_v27  ;;  %v886_v13 = vmul.f32 %v3029_v22, %v3052_v35 }
  0x3b   : > { %2726 = vmatmul.mubr.msk.f32.vlgmr.msra.gmra.mrb[0].mxu0 %vm1997_vm3, %v1965_v40  ;;  %v742_v48 = vrot.slane %v642_v43, 2  ;;  %v1516_v58 = vmul.f32 %v3040_v25, %v3163_v37  ;;  %v1056_v51 = vrot.slane %v957_v32, 1  ;;  %v1761_v54 = vmul.f32 %v3050_v34, %v3163_v37 }
  0x3c   : > { %v497_v50 = vsel %vm487_vm1, %v494_v53, %v496_v46  ;;  %v1301_v52 = vrot.slane %v1202_v47, 2  ;;  %v1476_v59 = vadd.f32 %v1444_v57, %v1407_v44  ;;  %v1859_v12 = vsel %vm733_vm2, %v1857_v33, %v1858_v36 }
  0x3d   : > { %v603_v60 = vadd.f32 %v497_v50, %v325_v30  ;;  %v743_v61 = vsel %vm733_vm2, %v740_v56, %v742_v48  ;;  %v1057_v63 = vsel %vm487_vm1, %v1054_v7, %v1056_v51  ;;  %v1445_v53 = vmul.f32 %v3060_v38, %v3113_v42 }
  0x3e   : > { %v1302_v4 = vsel %vm733_vm2, %v1299_v9, %v1301_v52  ;;  %v1615_v5 = vrot.slane %v1516_v58, 1  ;;  %v1721_v6 = vadd.f32 %v1614_v45, %v1476_v59  ;;  %v1860_v16 = vrot.slane %v1761_v54, 2 }
  0x3f   : > { %v849_v8 = vadd.f32 %v743_v61, %v603_v60  ;;  %v3196_v18 = vmax.f32 %v221_v55, 0.0  ;;  %v3198_v10 = vmax.f32 %v222_v62, 0.0  ;;  %v326_v19 = vmul.f32 %v2987_v1, %v3018_v15  ;;  %v223_v55 = vld [vmem:[%s2982_s7 + $0x70] sm:$0x3] }
  0x40   : > { %v397_v56 = vmul.f32 %v2992_v2, %v3018_v15  ;;  %v398_v7 = vmul.f32 %v2992_v2, %v3052_v35  ;;  %v1966_v9 = vadd.f32 %v1859_v12, %v1721_v6  ;;  %v643_v21 = vmul.f32 %v2997_v3, %v3018_v15 }
  0x41   : > { %v918_v20 = vadd.f32 %v886_v13, %v849_v8  ;;  %v644_v23 = vmul.f32 %v2997_v3, %v3052_v35  ;;  %v887_v31 = vmul.f32 %v3029_v22, %v3111_v41  ;;  %v958_v49 = vmul.f32 %v3007_v11, %v3111_v41 }
  0x42   : > { %v498_v24 = vrot.slane %v397_v56, 1  ;;  %v499_v29 = vrot.slane %v398_v7, 1  ;;  %2728 = vmatprep.mubr.msk.f32.mxu0 %vm1997_vm3, %v1966_v9  ;;  %v744_v33 = vrot.slane %v643_v21, 2  ;;  %v959_v40 = vmul.f32 %v3007_v11, %v3113_v42 }
  0x43   : > { %v1163_v57 = vadd.f32 %v1057_v63, %v918_v20  ;;  %v745_v39 = vrot.slane %v644_v23, 2  ;;  %v1058_v27 = vrot.slane %v958_v49, 1  ;;  %v1203_v30 = vmul.f32 %v3016_v14, %v3111_v41 }
  0x44   : > { %v500_v15 = vsel %vm487_vm1, %v498_v24, %v499_v29  ;;  %v1204_v43 = vmul.f32 %v3016_v14, %v3113_v42  ;;  %v1059_v47 = vrot.slane %v959_v40, 1  ;;  %v1616_v44 = vsel %vm487_vm1, %v1613_v26, %v1615_v5 }
  0x45   : > { %v1408_v45 = vadd.f32 %v1302_v4, %v1163_v57  ;;  %v604_v46 = vadd.f32 %v500_v15, %v326_v19  ;;  %v746_v32 = vsel %vm733_vm2, %v744_v33, %v745_v39  ;;  %v1303_v48 = vrot.slane %v1203_v30, 2  ;;  %v224_v57 = vld [vmem:[%s2982_s7 + $0x78] sm:$0xff]  ;;  %v225_v30 = vld [vmem:[%s2982_s7 + $0x80] sm:$0xff] }
  0x46   : > { %v1304_v13 = vrot.slane %v1204_v43, 2  ;;  %v1517_v58 = vmul.f32 %v3040_v25, %v3196_v18  ;;  %v1861_v51 = vsel %vm733_vm2, %v1858_v36, %v1860_v16  ;;  %v1518_v54 = vmul.f32 %v3040_v25, %v3198_v10 }
  0x47   : > { %v1477_v50 = vadd.f32 %v1445_v53, %v1408_v45  ;;  %v850_v52 = vadd.f32 %v746_v32, %v604_v46  ;;  %v1060_v59 = vsel %vm487_vm1, %v1058_v27, %v1059_v47  ;;  %v1762_v26 = vmul.f32 %v3050_v34, %v3196_v18 }
  0x48   : > { %v1617_v17 = vrot.slane %v1517_v58, 1  ;;  %v3239_v12 = vmul.f32 %v3050_v34, %v3198_v10  ;;  %v1446_v28 = vmul.f32 %v3060_v38, %v3196_v18  ;;  %v1618_v36 = vrot.slane %v1518_v54, 1 }
  0x49   : > { %v1722_v60 = vadd.f32 %v1616_v44, %v1477_v50  ;;  %v919_v61 = vadd.f32 %v887_v31, %v850_v52  ;;  %v1305_v62 = vsel %vm733_vm2, %v1303_v48, %v1304_v13  ;;  %v1862_v63 = vrot.slane %v1762_v26, 2 }
  0x4a   : > { %v3244_v4 = vmax.f32 %v223_v55, 0.0  ;;  %v399_v53 = vmul.f32 %v2992_v2, %v3086_v0  ;;  %v327_v8 = vmul.f32 %v2987_v1, %v3052_v35  ;;  %v645_v16 = vmul.f32 %v2997_v3, %v3086_v0 }
  0x4b   : > { %v1967_v5 = vadd.f32 %v1861_v51, %v1722_v60  ;;  %v1164_v6 = vadd.f32 %v1060_v59, %v919_v61  ;;  %v1619_v19 = vsel %vm487_vm1, %v1617_v17, %v1618_v36  ;;  %v1863_v56 = vrot.slane %v3239_v12, 2 }
  0x4c   : > { %v501_v7 = vrot.slane %v399_v53, 1  ;;  %v960_v9 = vmul.f32 %v3007_v11, %v3163_v37  ;;  %v747_v21 = vrot.slane %v645_v16, 2  ;;  %v888_v23 = vmul.f32 %v3029_v22, %v3113_v42 }
  0x4d   : > { %2729 = vmatmul.mubr.msk.f32.gmra.mrb[2].mxu0 %vm1997_vm3, %v1967_v5  ;;  %v1409_v20 = vadd.f32 %v1305_v62, %v1164_v6  ;;  %v1205_v35 = vmul.f32 %v3016_v14, %v3163_v37  ;;  %v1519_v31 = vmul.f32 %v3040_v25, %v3244_v4  ;;  %v1764_v49 = vmul.f32 %v3050_v34, %v3244_v4 }
  0x4e   : > { %v502_v0 = vsel %vm487_vm1, %v499_v29, %v501_v7  ;;  %v1061_v24 = vrot.slane %v960_v9, 1  ;;  %v748_v15 = vsel %vm733_vm2, %v745_v39, %v747_v21  ;;  %v1864_v43 = vsel %vm733_vm2, %v1862_v63, %v1863_v56 }
  0x4f   : > { %v1478_v33 = vadd.f32 %v1446_v28, %v1409_v20  ;;  %v605_v40 = vadd.f32 %v502_v0, %v327_v8  ;;  %v1306_v27 = vrot.slane %v1205_v35, 2  ;;  %v1447_v29 = vmul.f32 %v3060_v38, %v3198_v10 }
  0x50   : > { %v1062_v45 = vsel %vm487_vm1, %v1059_v47, %v1061_v24  ;;  %v1620_v46 = vrot.slane %v1519_v31, 1  ;;  %v1865_v48 = vrot.slane %v1764_v49, 2  ;;  %v3273_v58 = vmax.f32 %v224_v57, 0.0 }
  0x51   : > { %v1723_v32 = vadd.f32 %v1619_v19, %v1478_v33  ;;  %v851_v44 = vadd.f32 %v748_v15, %v605_v40  ;;  %v1307_v50 = vsel %vm733_vm2, %v1304_v13, %v1306_v27  ;;  %v3277_v39 = vmax.f32 %v225_v30, 0.0  ;;  %v226_v33 = vld [vmem:[%s2982_s7 + $0x88] sm:$0x3] }
  0x52   : > { %v1621_v51 = vsel %vm487_vm1, %v1618_v36, %v1620_v46  ;;  %v400_v52 = vmul.f32 %v2992_v2, %v3111_v41  ;;  %v401_v55 = vmul.f32 %v2992_v2, %v3113_v42  ;;  %v646_v59 = vmul.f32 %v2997_v3, %v3111_v41 }
  0x53   : > { %v1968_v54 = vadd.f32 %v1864_v43, %v1723_v32  ;;  %v920_v47 = vadd.f32 %v888_v23, %v851_v44  ;;  %v328_v17 = vmul.f32 %v2987_v1, %v3111_v41  ;;  %v647_v13 = vmul.f32 %v2997_v3, %v3113_v42 }
  0x54   : > { %v503_v26 = vrot.slane %v400_v52, 1  ;;  %v961_v12 = vmul.f32 %v3007_v11, %v3196_v18  ;;  %v504_v61 = vrot.slane %v401_v55, 1  ;;  %v749_v28 = vrot.slane %v646_v59, 2 }
  0x55   : > { %2731 = vmatprep.mubr.msk.f32.mxu0 %vm1997_vm3, %v1968_v54  ;;  %v1165_v60 = vadd.f32 %v1062_v45, %v920_v47  ;;  %v962_v36 = vmul.f32 %v3007_v11, %v3198_v10  ;;  %v750_v62 = vrot.slane %v647_v13, 2  ;;  %v889_v63 = vmul.f32 %v3029_v22, %v3196_v18 }
  0x56   : > { %v1206_v41 = vmul.f32 %v3016_v14, %v3196_v18  ;;  %v1207_v53 = vmul.f32 %v3016_v14, %v3198_v10  ;;  %v505_v6 = vsel %vm487_vm1, %v503_v26, %v504_v61  ;;  %v1063_v8 = vrot.slane %v961_v12, 1  ;;  %v227_v12 = vld [vmem:[%s2982_s7 + $0x90] sm:$0xff] }
  0x57   : > { %v1410_v5 = vadd.f32 %v1307_v50, %v1165_v60  ;;  %v1064_v16 = vrot.slane %v962_v36, 1  ;;  %v606_v19 = vadd.f32 %v505_v6, %v328_v17  ;;  %v751_v7 = vsel %vm733_vm2, %v749_v28, %v750_v62 }
  0x58   : > { %v1308_v9 = vrot.slane %v1206_v41, 2  ;;  %v1309_v20 = vrot.slane %v1207_v53, 2  ;;  %v1866_v23 = vsel %vm733_vm2, %v1863_v56, %v1865_v48  ;;  %v1520_v35 = vmul.f32 %v3040_v25, %v3273_v58  ;;  %v228_v41 = vld [vmem:[%s2982_s7 + $0x98] sm:$0xff] }
  0x59   : > { %v1479_v21 = vadd.f32 %v1447_v29, %v1410_v5  ;;  %v1521_v0 = vmul.f32 %v3040_v25, %v3277_v39  ;;  %v852_v24 = vadd.f32 %v751_v7, %v606_v19  ;;  %v1448_v31 = vmul.f32 %v3060_v38, %v3273_v58 }
  0x5a   : > { %v1765_v49 = vmul.f32 %v3050_v34, %v3273_v58  ;;  %v3313_v57 = vmul.f32 %v3050_v34, %v3277_v39  ;;  %v1065_v56 = vsel %vm487_vm1, %v1063_v8, %v1064_v16  ;;  %v1622_v15 = vrot.slane %v1520_v35, 1 }
  0x5b   : > { %v1724_v40 = vadd.f32 %v1621_v51, %v1479_v21  ;;  %v1623_v27 = vrot.slane %v1521_v0, 1  ;;  %v921_v30 = vadd.f32 %v889_v63, %v852_v24  ;;  %v1310_v43 = vsel %vm733_vm2, %v1308_v9, %v1309_v20 }
  0x5c   : > { %v1867_v45 = vrot.slane %v1765_v49, 2  ;;  %v1868_v29 = vrot.slane %v3313_v57, 2  ;;  %v3319_v32 = vmax.f32 %v226_v33, 0.0  ;;  %v402_v44 = vmul.f32 %v2992_v2, %v3163_v37 }
  0x5d   : > { %v1969_v46 = vadd.f32 %v1866_v23, %v1724_v40  ;;  %v648_v48 = vmul.f32 %v2997_v3, %v3163_v37  ;;  %v1166_v50 = vadd.f32 %v1065_v56, %v921_v30  ;;  %v1624_v51 = vsel %vm487_vm1, %v1622_v15, %v1623_v27 }
  0x5e   : > { %v329_v52 = vmul.f32 %v2987_v1, %v3113_v42  ;;  %v963_v54 = vmul.f32 %v3007_v11, %v3244_v4  ;;  %v1869_v47 = vsel %vm733_vm2, %v1867_v45, %v1868_v29  ;;  %v506_v55 = vrot.slane %v402_v44, 1 }
  0x5f   : > { %2732 = vmatmul.mubr.msk.f32.gmra.mrb[4].mxu0 %vm1997_vm3, %v1969_v46  ;;  %v752_v59 = vrot.slane %v648_v48, 2  ;;  %v1208_v37 = vmul.f32 %v3016_v14, %v3244_v4  ;;  %v1411_v17 = vadd.f32 %v1310_v43, %v1166_v50  ;;  %v1522_v42 = vmul.f32 %v3040_v25, %v3319_v32 }
  0x60   : > { %v1066_v26 = vrot.slane %v963_v54, 1  ;;  %v1767_v13 = vmul.f32 %v3050_v34, %v3319_v32  ;;  %v507_v60 = vsel %vm487_vm1, %v504_v61, %v506_v55  ;;  %v890_v36 = vmul.f32 %v3029_v22, %v3198_v10 }
  0x61   : > { %v753_v28 = vsel %vm733_vm2, %v750_v62, %v752_v59  ;;  %v1311_v63 = vrot.slane %v1208_v37, 2  ;;  %v1480_v53 = vadd.f32 %v1448_v31, %v1411_v17  ;;  %v607_v5 = vadd.f32 %v507_v60, %v329_v52 }
  0x62   : > { %v1449_v6 = vmul.f32 %v3060_v38, %v3277_v39  ;;  %v1625_v8 = vrot.slane %v1522_v42, 1  ;;  %v1067_v19 = vsel %vm487_vm1, %v1064_v16, %v1066_v26  ;;  %v1870_v9 = vrot.slane %v1767_v13, 2 }
  0x63   : > { %v1312_v7 = vsel %vm733_vm2, %v1309_v20, %v1311_v63  ;;  %v3350_v21 = vmax.f32 %v227_v12, 0.0  ;;  %v1725_v61 = vadd.f32 %v1624_v51, %v1480_v53  ;;  %v853_v62 = vadd.f32 %v753_v28, %v607_v5  ;;  %v229_v28 = vld [vmem:[%s2982_s7 + $0xa0] sm:$0x3] }
  0x64   : > { %v3352_v23 = vmax.f32 %v228_v41, 0.0  ;;  %v403_v35 = vmul.f32 %v2992_v2, %v3196_v18  ;;  %v330_v0 = vmul.f32 %v2987_v1, %v3196_v18  ;;  %v404_v24 = vmul.f32 %v2992_v2, %v3198_v10 }
  0x65   : > { %v649_v16 = vmul.f32 %v2997_v3, %v3196_v18  ;;  %v650_v20 = vmul.f32 %v2997_v3, %v3198_v10  ;;  %v1970_v31 = vadd.f32 %v1869_v47, %v1725_v61  ;;  %v922_v49 = vadd.f32 %v890_v36, %v853_v62 }
  0x66   : > { %v1626_v33 = vsel %vm487_vm1, %v1623_v27, %v1625_v8  ;;  %v508_v40 = vrot.slane %v403_v35, 1  ;;  %v509_v56 = vrot.slane %v404_v24, 1  ;;  %v964_v43 = vmul.f32 %v3007_v11, %v3273_v58 }
  0x67   : > { %v754_v15 = vrot.slane %v649_v16, 2  ;;  %v755_v30 = vrot.slane %v650_v20, 2  ;;  %2734 = vmatprep.mubr.msk.f32.mxu0 %vm1997_vm3, %v1970_v31  ;;  %v1167_v45 = vadd.f32 %v1067_v19, %v922_v49  ;;  %v965_v18 = vmul.f32 %v3007_v11, %v3277_v39 }
  0x68   : > { %v1209_v46 = vmul.f32 %v3016_v14, %v3273_v58  ;;  %v1210_v44 = vmul.f32 %v3016_v14, %v3277_v39  ;;  %v510_v27 = vsel %vm487_vm1, %v508_v40, %v509_v56  ;;  %v891_v50 = vmul.f32 %v3029_v22, %v3273_v58 }
  0x69   : > { %v756_v48 = vsel %vm733_vm2, %v754_v15, %v755_v30  ;;  %v1068_v51 = vrot.slane %v964_v43, 1  ;;  %v1412_v52 = vadd.f32 %v1312_v7, %v1167_v45  ;;  %v608_v54 = vadd.f32 %v510_v27, %v330_v0 }
  0x6a   : > { %v1069_v47 = vrot.slane %v965_v18, 1  ;;  %v1313_v55 = vrot.slane %v1209_v46, 2  ;;  %v1314_v59 = vrot.slane %v1210_v44, 2  ;;  %v1523_v37 = vmul.f32 %v3040_v25, %v3350_v21  ;;  %v230_v18 = vld [vmem:[%s2982_s7 + $0xa8] sm:$0xff]  ;;  %v231_v46 = vld [vmem:[%s2982_s7 + $0xb0] sm:$0xff] }
  0x6b   : > { %v1524_v17 = vmul.f32 %v3040_v25, %v3352_v23  ;;  %v1768_v26 = vmul.f32 %v3050_v34, %v3350_v21  ;;  %v1481_v42 = vadd.f32 %v1449_v6, %v1412_v52  ;;  %v1871_v13 = vsel %vm733_vm2, %v1868_v29, %v1870_v9 }
  0x6c   : > { %v854_v12 = vadd.f32 %v756_v48, %v608_v54  ;;  %v3389_v60 = vmul.f32 %v3050_v34, %v3352_v23  ;;  %v1070_v36 = vsel %vm487_vm1, %v1068_v51, %v1069_v47  ;;  %v1450_v63 = vmul.f32 %v3060_v38, %v3350_v21 }
  0x6d   : > { %v1627_v41 = vrot.slane %v1523_v37, 1  ;;  %v1628_v53 = vrot.slane %v1524_v17, 1  ;;  %v1726_v5 = vadd.f32 %v1626_v33, %v1481_v42  ;;  %v1872_v6 = vrot.slane %v1768_v26, 2 }
  0x6e   : > { %v923_v8 = vadd.f32 %v891_v50, %v854_v12  ;;  %v1873_v57 = vrot.slane %v3389_v60, 2  ;;  %v1315_v29 = vsel %vm733_vm2, %v1313_v55, %v1314_v59  ;;  %v3397_v19 = vmax.f32 %v229_v28, 0.0 }
  0x6f   : > { %v405_v7 = vmul.f32 %v2992_v2, %v3244_v4  ;;  %v651_v9 = vmul.f32 %v2997_v3, %v3244_v4  ;;  %v1971_v61 = vadd.f32 %v1871_v13, %v1726_v5  ;;  %v1629_v35 = vsel %vm487_vm1, %v1627_v41, %v1628_v53 }
  0x70   : > { %v1168_v62 = vadd.f32 %v1070_v36, %v923_v8  ;;  %v331_v0 = vmul.f32 %v2987_v1, %v3198_v10  ;;  %v966_v20 = vmul.f32 %v3007_v11, %v3319_v32  ;;  %v1211_v31 = vmul.f32 %v3016_v14, %v3319_v32 }
  0x71   : > { %v511_v24 = vrot.slane %v405_v7, 1  ;;  %v757_v16 = vrot.slane %v651_v9, 2  ;;  %2735 = vmatmul.mubr.msk.f32.gmra.mrb[6].mxu0 %vm1997_vm3, %v1971_v61  ;;  %v1874_v49 = vsel %vm733_vm2, %v1872_v6, %v1873_v57  ;;  %v1525_v33 = vmul.f32 %v3040_v25, %v3397_v19 }
  0x72   : > { %v1413_v4 = vadd.f32 %v1315_v29, %v1168_v62  ;;  %v1770_v10 = vmul.f32 %v3050_v34, %v3397_v19  ;;  %v1071_v43 = vrot.slane %v966_v20, 1  ;;  %v1316_v45 = vrot.slane %v1211_v31, 2 }
  0x73   : > { %v512_v40 = vsel %vm487_vm1, %v509_v56, %v511_v24  ;;  %v758_v15 = vsel %vm733_vm2, %v755_v30, %v757_v16  ;;  %v892_v48 = vmul.f32 %v3029_v22, %v3277_v39  ;;  %v1630_v50 = vrot.slane %v1525_v33, 1 }
  0x74   : > { %v1482_v44 = vadd.f32 %v1450_v63, %v1413_v4  ;;  %v609_v27 = vadd.f32 %v512_v40, %v331_v0  ;;  %v1072_v51 = vsel %vm487_vm1, %v1069_v47, %v1071_v43  ;;  %v1317_v52 = vsel %vm733_vm2, %v1314_v59, %v1316_v45  ;;  %v232_v43 = vld [vmem:[%s2982_s7 + $0xb8] sm:$0x3] }
  0x75   : > { %v1451_v54 = vmul.f32 %v3060_v38, %v3352_v23  ;;  %v1875_v56 = vrot.slane %v1770_v10, 2  ;;  %v3428_v37 = vmax.f32 %v230_v18, 0.0  ;;  %v3430_v17 = vmax.f32 %v231_v46, 0.0 }
  0x76   : > { %v1727_v55 = vadd.f32 %v1629_v35, %v1482_v44  ;;  %v855_v30 = vadd.f32 %v758_v15, %v609_v27  ;;  %v1631_v26 = vsel %vm487_vm1, %v1628_v53, %v1630_v50  ;;  %v406_v42 = vmul.f32 %v2992_v2, %v3273_v58 }
  0x77   : > { %v407_v47 = vmul.f32 %v2992_v2, %v3277_v39  ;;  %v652_v59 = vmul.f32 %v2997_v3, %v3273_v58  ;;  %v332_v28 = vmul.f32 %v2987_v1, %v3273_v58  ;;  %v653_v36 = vmul.f32 %v2997_v3, %v3277_v39 }
  0x78   : > { %v1972_v13 = vadd.f32 %v1874_v49, %v1727_v55  ;;  %v924_v12 = vadd.f32 %v892_v48, %v855_v30  ;;  %v513_v63 = vrot.slane %v406_v42, 1  ;;  %v967_v5 = vmul.f32 %v3007_v11, %v3350_v21 }
  0x79   : > { %v514_v41 = vrot.slane %v407_v47, 1  ;;  %v759_v53 = vrot.slane %v652_v59, 2  ;;  %v760_v6 = vrot.slane %v653_v36, 2  ;;  %v968_v29 = vmul.f32 %v3007_v11, %v3352_v23 }
  0x7a   : > { %2737 = vmatprep.mubr.msk.f32.mxu0 %vm1997_vm3, %v1972_v13  ;;  %v1169_v8 = vadd.f32 %v1072_v51, %v924_v12  ;;  %v1212_v7 = vmul.f32 %v3016_v14, %v3350_v21  ;;  %v893_v9 = vmul.f32 %v3029_v22, %v3350_v21  ;;  %v1073_v61 = vrot.slane %v967_v5, 1 }
  0x7b   : > { %v515_v58 = vsel %vm487_vm1, %v513_v63, %v514_v41  ;;  %v1213_v62 = vmul.f32 %v3016_v14, %v3352_v23  ;;  %v761_v24 = vsel %vm733_vm2, %v759_v53, %v760_v6  ;;  %v1074_v16 = vrot.slane %v968_v29, 1 }
  0x7c   : > { %v1414_v35 = vadd.f32 %v1317_v52, %v1169_v8  ;;  %v610_v0 = vadd.f32 %v515_v58, %v332_v28  ;;  %v1318_v20 = vrot.slane %v1212_v7, 2  ;;  %v1526_v4 = vmul.f32 %v3040_v25, %v3428_v37  ;;  %v233_v8 = vld [vmem:[%s2982_s7 + $0xc0] sm:$0xff] }
  0x7d   : > { %v1319_v31 = vrot.slane %v1213_v62, 2  ;;  %v3460_v49 = vmul.f32 %v3040_v25, %v3430_v17  ;;  %v1876_v10 = vsel %vm733_vm2, %v1873_v57, %v1875_v56  ;;  %v1771_v15 = vmul.f32 %v3050_v34, %v3428_v37 }
  0x7e   : > { %v1483_v33 = vadd.f32 %v1451_v54, %v1414_v35  ;;  %v856_v40 = vadd.f32 %v761_v24, %v610_v0  ;;  %v1075_v45 = vsel %vm487_vm1, %v1073_v61, %v1074_v16  ;;  %v1632_v18 = vrot.slane %v1526_v4, 1  ;;  %v234_v61 = vld [vmem:[%s2982_s7 + $0xc8] sm:$0xff] }
  0x7f   : > { %v1633_v46 = vrot.slane %v3460_v49, 1  ;;  %v3472_v44 = vmul.f32 %v3050_v34, %v3430_v17  ;;  %v1320_v60 = vsel %vm733_vm2, %v1318_v20, %v1319_v31  ;;  %v1452_v57 = vmul.f32 %v3060_v38, %v3428_v37 }
  0x80   : > { %v1728_v27 = vadd.f32 %v1631_v26, %v1483_v33  ;;  %v925_v48 = vadd.f32 %v893_v9, %v856_v40  ;;  %v1877_v50 = vrot.slane %v1771_v15, 2  ;;  %v3478_v52 = vmax.f32 %v232_v43, 0.0 }
  0x81   : > { %v1878_v51 = vrot.slane %v3472_v44, 2  ;;  %v408_v54 = vmul.f32 %v2992_v2, %v3319_v32  ;;  %v333_v30 = vmul.f32 %v2987_v1, %v3277_v39  ;;  %v654_v26 = vmul.f32 %v2997_v3, %v3319_v32 }
  0x82   : > { %v1973_v56 = vadd.f32 %v1876_v10, %v1728_v27  ;;  %v1170_v55 = vadd.f32 %v1075_v45, %v925_v48  ;;  %v1634_v42 = vsel %vm487_vm1, %v1632_v18, %v1633_v46  ;;  %v969_v59 = vmul.f32 %v3007_v11, %v3397_v19 }
  0x83   : > { %v516_v47 = vrot.slane %v408_v54, 1  ;;  %v1214_v13 = vmul.f32 %v3016_v14, %v3397_v19  ;;  %v762_v28 = vrot.slane %v654_v26, 2  ;;  %v894_v39 = vmul.f32 %v3029_v22, %v3352_v23 }
  0x84   : > { %2738 = vmatmul.mubr.msk.f32.gmra.mrb[8].mxu0 %vm1997_vm3, %v1973_v56  ;;  %v1415_v12 = vadd.f32 %v1320_v60, %v1170_v55  ;;  %v1528_v32 = vmul.f32 %v3040_v25, %v3478_v52  ;;  %v1076_v63 = vrot.slane %v969_v59, 1  ;;  %v1773_v5 = vmul.f32 %v3050_v34, %v3478_v52 }
  0x85   : > { %v517_v36 = vsel %vm487_vm1, %v514_v41, %v516_v47  ;;  %v1321_v53 = vrot.slane %v1214_v13, 2  ;;  %v1879_v7 = vsel %vm733_vm2, %v1877_v50, %v1878_v51  ;;  %v763_v9 = vsel %vm733_vm2, %v760_v6, %v762_v28 }
  0x86   : > { %v1484_v29 = vadd.f32 %v1452_v57, %v1415_v12  ;;  %v611_v58 = vadd.f32 %v517_v36, %v333_v30  ;;  %v1077_v62 = vsel %vm487_vm1, %v1074_v16, %v1076_v63  ;;  %v1453_v41 = vmul.f32 %v3060_v38, %v3430_v17 }
  0x87   : > { %v1322_v35 = vsel %vm733_vm2, %v1319_v31, %v1321_v53  ;;  %v1635_v0 = vrot.slane %v1528_v32, 1  ;;  %v1880_v4 = vrot.slane %v1773_v5, 2  ;;  %v3511_v33 = vmax.f32 %v233_v8, 0.0 }
  0x88   : > { %v1729_v24 = vadd.f32 %v1634_v42, %v1484_v29  ;;  %v857_v20 = vadd.f32 %v763_v9, %v611_v58  ;;  %v3513_v10 = vmax.f32 %v234_v61, 0.0  ;;  %v334_v40 = vmul.f32 %v2987_v1, %v3350_v21  ;;  %v3576_v29 = vld [vmem:[%s4648_s1 + $0x1] ss:$0 sm:$0xff] }
  0x89   : > { %v409_v6 = vmul.f32 %v2992_v2, %v3350_v21  ;;  %v3521_v16 = vmul.f32 %v2992_v2, %v3352_v23  ;;  %v655_v43 = vmul.f32 %v2997_v3, %v3350_v21  ;;  %v3527_v45 = vmul.f32 %v2997_v3, %v3352_v23 }
  0x8a   : > { %v1974_v31 = vadd.f32 %v1879_v7, %v1729_v24  ;;  %v926_v15 = vadd.f32 %v894_v39, %v857_v20  ;;  %v895_v1 = vmul.f32 %v3029_v22, %v3428_v37  ;;  %v970_v48 = vmul.f32 %v3007_v11, %v3428_v37  ;;  %v235_v39 = vld [vmem:[%s2982_s7 + $0xd0] sm:$0x3]  ;;  %v3599_v20 = vld [vmem:[%s4648_s1 + $0x4] ss:$0 sm:$0xff] }
  0x8b   : > { %v518_v18 = vrot.slane %v409_v6, 1  ;;  %v519_v27 = vrot.slane %v3521_v16, 1  ;;  %v764_v60 = vrot.slane %v655_v43, 2  ;;  %v765_v57 = vrot.slane %v3527_v45, 2  ;;  %v3614_v16 = vld [vmem:[%s4648_s1 + $0x5] ss:$0 sm:$0xff] }
  0x8c   : > { %2740 = vmatprep.mubr.msk.f32.mxu0 %vm1997_vm3, %v1974_v31  ;;  %v1171_v2 = vadd.f32 %v1077_v62, %v926_v15  ;;  %v3538_v21 = vmul.f32 %v3007_v11, %v3430_v17  ;;  %v1078_v50 = vrot.slane %v970_v48, 1  ;;  %v1215_v22 = vmul.f32 %v3016_v14, %v3428_v37  ;;  %v3590_v62 = vld [vmem:[%s4648_s1 + $0x2] ss:$0 sm:$0xff]  ;;  %v3622_v45 = vld [vmem:[%s4648_s1 + $0x7] ss:$0 sm:$0xff]  ;;  %v236_v48 = vld [vmem:[%s2982_s7 + $0xd8] sm:$0xff] }
  0x8d   : > { %v520_v3 = vsel %vm487_vm1, %v518_v18, %v519_v27  ;;  %v3545_v54 = vmul.f32 %v3016_v14, %v3430_v17  ;;  %v766_v30 = vsel %vm733_vm2, %v764_v60, %v765_v57  ;;  %v1636_v11 = vsel %vm487_vm1, %v1633_v46, %v1635_v0 }
  0x8e   : > { %v1416_v56 = vadd.f32 %v1322_v35, %v1171_v2  ;;  %v612_v55 = vadd.f32 %v520_v3, %v334_v40  ;;  %v1079_v26 = vrot.slane %v3538_v21, 1  ;;  %v1323_v42 = vrot.slane %v1215_v22, 2 }
  0x8f   : > { %v1324_v47 = vrot.slane %v3545_v54, 2  ;;  %v1529_v59 = vmul.f32 %v3040_v25, %v3511_v33  ;;  %v1881_v14 = vsel %vm733_vm2, %v1878_v51, %v1880_v4  ;;  %v1530_v28 = vmul.f32 %v3040_v25, %v3513_v10  ;;  %v3636_v54 = vld [vmem:[%s4648_s1 + $0x6] ss:$0 sm:$0xff] }
  0x90   : > { %v1485_v13 = vadd.f32 %v1453_v41, %v1416_v56  ;;  %v858_v12 = vadd.f32 %v766_v30, %v612_v55  ;;  %v1080_v49 = vsel %vm487_vm1, %v1078_v50, %v1079_v26  ;;  %v1774_v46 = vmul.f32 %v3050_v34, %v3511_v33  ;;  %v237_v50 = vld [vmem:[%s2982_s7 + $0xe0] sm:$0xff] }
  0x91   : > { %v1637_v32 = vrot.slane %v1529_v59, 1  ;;  %v3566_v36 = vmul.f32 %v3050_v34, %v3513_v10  ;;  %v1454_v44 = vmul.f32 %v3060_v38, %v3511_v33  ;;  %v1638_v51 = vrot.slane %v1530_v28, 1  ;;  %v3583_v38 = vld [vmem:[%s4648_s1] ss:$0 sm:$0xff] }
  0x92   : > { %v1730_v63 = vadd.f32 %v1636_v11, %v1485_v13  ;;  %v927_v53 = vadd.f32 %v895_v1, %v858_v12  ;;  %v1325_v5 = vsel %vm733_vm2, %v1323_v42, %v1324_v47  ;;  %v1882_v25 = vrot.slane %v1774_v46, 2 }
  0x93   : > { %v3571_v8 = vmax.f32 %v235_v39, 0.0  ;;  %v411_v7 = vmul.f32 %v3576_v29, %v3397_v19  ;;  %v335_v61 = vmul.f32 %v3583_v38, %v3352_v23  ;;  %v657_v35 = vmul.f32 %v3590_v62, %v3397_v19  ;;  %v3607_v19 = vld [vmem:[%s4648_s1 + $0x3] ss:$0 sm:$0xff] }
  0x94   : > { %v1975_v58 = vadd.f32 %v1881_v14, %v1730_v63  ;;  %v1172_v9 = vadd.f32 %v1080_v49, %v927_v53  ;;  %v1639_v41 = vsel %vm487_vm1, %v1637_v32, %v1638_v51  ;;  %v1883_v0 = vrot.slane %v3566_v36, 2 }
  0x95   : > { %v521_v24 = vrot.slane %v411_v7, 1  ;;  %v972_v23 = vmul.f32 %v3599_v20, %v3478_v52  ;;  %v767_v40 = vrot.slane %v657_v35, 2  ;;  %v896_v6 = vmul.f32 %v3607_v19, %v3430_v17 }
  0x96   : > { %2741 = vmatmul.mubr.msk.f32.gmra.mrb[10].mxu0 %vm1997_vm3, %v1975_v58  ;;  %v1417_v4 = vadd.f32 %v1325_v5, %v1172_v9  ;;  %v1217_v31 = vmul.f32 %v3614_v16, %v3478_v52  ;;  %v1531_v18 = vmul.f32 %v3622_v45, %v3571_v8  ;;  %v1776_v1 = vmul.f32 %v3050_v34, %v3571_v8 }
  0x97   : > { %v522_v15 = vsel %vm487_vm1, %v519_v27, %v521_v24  ;;  %v1081_v43 = vrot.slane %v972_v23, 1  ;;  %v768_v21 = vsel %vm733_vm2, %v765_v57, %v767_v40  ;;  %v1884_v27 = vsel %vm733_vm2, %v1882_v25, %v1883_v0 }
  0x98   : > { %v1486_v2 = vadd.f32 %v1454_v44, %v1417_v4  ;;  %v613_v60 = vadd.f32 %v522_v15, %v335_v61  ;;  %v1326_v3 = vrot.slane %v1217_v31, 2  ;;  %v1455_v56 = vmul.f32 %v3636_v54, %v3513_v10 }
  0x99   : > { %v1082_v22 = vsel %vm487_vm1, %v1079_v26, %v1081_v43  ;;  %v1640_v34 = vrot.slane %v1531_v18, 1  ;;  %v1885_v11 = vrot.slane %v1776_v1, 2  ;;  %v3640_v42 = vmax.f32 %v236_v48, 0.0  ;;  %v3679_v18 = vld [vmem:[%s4648_s1 + $0x8] ss:$0 sm:$0xff] }
  0x9a   : > { %v1731_v55 = vadd.f32 %v1639_v41, %v1486_v2  ;;  %v859_v30 = vadd.f32 %v768_v21, %v613_v60  ;;  %v1327_v57 = vsel %vm733_vm2, %v1324_v47, %v1326_v3  ;;  %v3644_v13 = vmax.f32 %v237_v50, 0.0  ;;  %v238_v48 = vld [vmem:[%s2982_s7 + $0xe8] sm:$0x3] }
  0x9b   : > { %v1641_v59 = vsel %vm487_vm1, %v1638_v51, %v1640_v34  ;;  %v412_v26 = vmul.f32 %v3576_v29, %v3428_v37  ;;  %v413_v28 = vmul.f32 %v3576_v29, %v3430_v17  ;;  %v658_v39 = vmul.f32 %v3590_v62, %v3428_v37 }
  0x9c   : > { %v1976_v14 = vadd.f32 %v1884_v27, %v1731_v55  ;;  %v928_v12 = vadd.f32 %v896_v6, %v859_v30  ;;  %v336_v49 = vmul.f32 %v3583_v38, %v3428_v37  ;;  %v659_v47 = vmul.f32 %v3590_v62, %v3430_v17 }
  0x9d   : > { %v523_v32 = vrot.slane %v412_v26, 1  ;;  %v973_v46 = vmul.f32 %v3599_v20, %v3511_v33  ;;  %v524_v63 = vrot.slane %v413_v28, 1  ;;  %v769_v53 = vrot.slane %v658_v39, 2 }
  0x9e   : > { %2743 = vmatprep.mubr.msk.f32.mxu0 %vm1997_vm3, %v1976_v14  ;;  %v1173_v36 = vadd.f32 %v1082_v22, %v928_v12  ;;  %v974_v44 = vmul.f32 %v3599_v20, %v3513_v10  ;;  %v770_v51 = vrot.slane %v659_v47, 2  ;;  %v897_v5 = vmul.f32 %v3607_v19, %v3511_v33 }
  0x9f   : > { %v1218_v37 = vmul.f32 %v3614_v16, %v3511_v33  ;;  %v1219_v25 = vmul.f32 %v3614_v16, %v3513_v10  ;;  %v525_v58 = vsel %vm487_vm1, %v523_v32, %v524_v63  ;;  %v1083_v9 = vrot.slane %v973_v46, 1  ;;  %v239_v46 = vld [vmem:[%s2982_s7 + $0xf0] sm:$0xff] }
  0xa0   : > { %v1418_v7 = vadd.f32 %v1327_v57, %v1173_v36  ;;  %v1084_v61 = vrot.slane %v974_v44, 1  ;;  %v614_v35 = vadd.f32 %v525_v58, %v336_v49  ;;  %v771_v41 = vsel %vm733_vm2, %v769_v53, %v770_v51 }
  0xa1   : > { %v1328_v24 = vrot.slane %v1218_v37, 2  ;;  %v1329_v23 = vrot.slane %v1219_v25, 2  ;;  %v1886_v40 = vsel %vm733_vm2, %v1883_v0, %v1885_v11  ;;  %v1532_v6 = vmul.f32 %v3622_v45, %v3640_v42  ;;  %v240_v37 = vld [vmem:[%s2982_s7 + $0xf8] sm:$0xff] }
  0xa2   : > { %v1487_v4 = vadd.f32 %v1455_v56, %v1418_v7  ;;  %v1533_v31 = vmul.f32 %v3622_v45, %v3644_v13  ;;  %v860_v15 = vadd.f32 %v771_v41, %v614_v35  ;;  %v1456_v43 = vmul.f32 %v3636_v54, %v3640_v42 }
  0xa3   : > { %v1777_v1 = vmul.f32 %v3679_v18, %v3640_v42  ;;  %v3685_v0 = vmul.f32 %v3679_v18, %v3644_v13  ;;  %v1085_v60 = vsel %vm487_vm1, %v1083_v9, %v1084_v61  ;;  %v1642_v21 = vrot.slane %v1532_v6, 1 }
  0xa4   : > { %v1732_v2 = vadd.f32 %v1641_v59, %v1487_v4  ;;  %v1643_v3 = vrot.slane %v1533_v31, 1  ;;  %v929_v50 = vadd.f32 %v897_v5, %v860_v15  ;;  %v1330_v27 = vsel %vm733_vm2, %v1328_v24, %v1329_v23 }
  0xa5   : > { %v1887_v22 = vrot.slane %v1777_v1, 2  ;;  %v1888_v56 = vrot.slane %v3685_v0, 2  ;;  %v3691_v55 = vmax.f32 %v238_v48, 0.0  ;;  %v414_v30 = vmul.f32 %v3576_v29, %v3478_v52 }
  0xa6   : > { %v1977_v34 = vadd.f32 %v1886_v40, %v1732_v2  ;;  %v660_v11 = vmul.f32 %v3590_v62, %v3478_v52  ;;  %v1174_v57 = vadd.f32 %v1085_v60, %v929_v50  ;;  %v1644_v59 = vsel %vm487_vm1, %v1642_v21, %v1643_v3 }
  0xa7   : > { %v337_v26 = vmul.f32 %v3583_v38, %v3430_v17  ;;  %v975_v14 = vmul.f32 %v3599_v20, %v3571_v8  ;;  %v1889_v12 = vsel %vm733_vm2, %v1887_v22, %v1888_v56  ;;  %v526_v28 = vrot.slane %v414_v30, 1 }
  0xa8   : > { %2744 = vmatmul.mubr.msk.f32.gmra.mrb[12].mxu0 %vm1997_vm3, %v1977_v34  ;;  %v772_v39 = vrot.slane %v660_v11, 2  ;;  %v1220_v52 = vmul.f32 %v3614_v16, %v3571_v8  ;;  %v1419_v49 = vadd.f32 %v1330_v27, %v1174_v57  ;;  %v1534_v17 = vmul.f32 %v3622_v45, %v3691_v55 }
  0xa9   : > { %v1086_v32 = vrot.slane %v975_v14, 1  ;;  %v1779_v47 = vmul.f32 %v3679_v18, %v3691_v55  ;;  %v527_v36 = vsel %vm487_vm1, %v524_v63, %v526_v28  ;;  %v898_v44 = vmul.f32 %v3607_v19, %v3513_v10 }
  0xaa   : > { %v773_v53 = vsel %vm733_vm2, %v770_v51, %v772_v39  ;;  %v1331_v5 = vrot.slane %v1220_v52, 2  ;;  %v1488_v25 = vadd.f32 %v1456_v43, %v1419_v49  ;;  %v615_v7 = vadd.f32 %v527_v36, %v337_v26 }
  0xab   : > { %v1457_v58 = vmul.f32 %v3636_v54, %v3644_v13  ;;  %v1645_v9 = vrot.slane %v1534_v17, 1  ;;  %v1087_v35 = vsel %vm487_vm1, %v1084_v61, %v1086_v32  ;;  %v1890_v24 = vrot.slane %v1779_v47, 2 }
  0xac   : > { %v1332_v41 = vsel %vm733_vm2, %v1329_v23, %v1331_v5  ;;  %v3722_v4 = vmax.f32 %v239_v46, 0.0  ;;  %v1733_v63 = vadd.f32 %v1644_v59, %v1488_v25  ;;  %v861_v51 = vadd.f32 %v773_v53, %v615_v7  ;;  %v241_v53 = vld [vmem:[%s2982_s7 + $0x100] sm:$0x3] }
  0xad   : > { %v3724_v40 = vmax.f32 %v240_v37, 0.0  ;;  %v415_v6 = vmul.f32 %v3576_v29, %v3511_v33  ;;  %v338_v31 = vmul.f32 %v3583_v38, %v3511_v33  ;;  %v416_v15 = vmul.f32 %v3576_v29, %v3513_v10 }
  0xae   : > { %v661_v61 = vmul.f32 %v3590_v62, %v3511_v33  ;;  %v662_v23 = vmul.f32 %v3590_v62, %v3513_v10  ;;  %v1978_v43 = vadd.f32 %v1889_v12, %v1733_v63  ;;  %v930_v1 = vadd.f32 %v898_v44, %v861_v51 }
  0xaf   : > { %v1646_v48 = vsel %vm487_vm1, %v1643_v3, %v1645_v9  ;;  %v528_v2 = vrot.slane %v415_v6, 1  ;;  %v529_v60 = vrot.slane %v416_v15, 1  ;;  %v976_v27 = vmul.f32 %v3599_v20, %v3640_v42 }
  0xb0   : > { %v774_v21 = vrot.slane %v661_v61, 2  ;;  %v775_v50 = vrot.slane %v662_v23, 2  ;;  %2746 = vmatprep.mubr.msk.f32.mxu0 %vm1997_vm3, %v1978_v43  ;;  %v1175_v22 = vadd.f32 %v1087_v35, %v930_v1  ;;  %v977_v33 = vmul.f32 %v3599_v20, %v3644_v13 }
  0xb1   : > { %v1221_v34 = vmul.f32 %v3614_v16, %v3640_v42  ;;  %v1222_v30 = vmul.f32 %v3614_v16, %v3644_v13  ;;  %v530_v3 = vsel %vm487_vm1, %v528_v2, %v529_v60  ;;  %v899_v57 = vmul.f32 %v3607_v19, %v3640_v42 }
  0xb2   : > { %v776_v11 = vsel %vm733_vm2, %v774_v21, %v775_v50  ;;  %v1088_v59 = vrot.slane %v976_v27, 1  ;;  %v1420_v26 = vadd.f32 %v1332_v41, %v1175_v22  ;;  %v616_v14 = vadd.f32 %v530_v3, %v338_v31 }
  0xb3   : > { %v1089_v12 = vrot.slane %v977_v33, 1  ;;  %v1333_v28 = vrot.slane %v1221_v34, 2  ;;  %v1334_v39 = vrot.slane %v1222_v30, 2  ;;  %v1535_v52 = vmul.f32 %v3622_v45, %v3722_v4  ;;  %v242_v33 = vld [vmem:[%s2982_s7 + $0x108] sm:$0xff]  ;;  %v243_v34 = vld [vmem:[%s2982_s7 + $0x110] sm:$0xff] }
  0xb4   : > { %v1536_v49 = vmul.f32 %v3622_v45, %v3724_v40  ;;  %v1780_v32 = vmul.f32 %v3679_v18, %v3722_v4  ;;  %v1489_v17 = vadd.f32 %v1457_v58, %v1420_v26  ;;  %v1891_v47 = vsel %vm733_vm2, %v1888_v56, %v1890_v24 }
  0xb5   : > { %v862_v46 = vadd.f32 %v776_v11, %v616_v14  ;;  %v3761_v36 = vmul.f32 %v3679_v18, %v3724_v40  ;;  %v1090_v44 = vsel %vm487_vm1, %v1088_v59, %v1089_v12  ;;  %v1458_v5 = vmul.f32 %v3636_v54, %v3722_v4 }
  0xb6   : > { %v1647_v37 = vrot.slane %v1535_v52, 1  ;;  %v1648_v25 = vrot.slane %v1536_v49, 1  ;;  %v1734_v7 = vadd.f32 %v1646_v48, %v1489_v17  ;;  %v1892_v58 = vrot.slane %v1780_v32, 2 }
  0xb7   : > { %v931_v9 = vadd.f32 %v899_v57, %v862_v46  ;;  %v1893_v0 = vrot.slane %v3761_v36, 2  ;;  %v1335_v56 = vsel %vm733_vm2, %v1333_v28, %v1334_v39  ;;  %v3769_v35 = vmax.f32 %v241_v53, 0.0 }
  0xb8   : > { %v417_v41 = vmul.f32 %v3576_v29, %v3571_v8  ;;  %v663_v24 = vmul.f32 %v3590_v62, %v3571_v8  ;;  %v1979_v63 = vadd.f32 %v1891_v47, %v1734_v7  ;;  %v1649_v6 = vsel %vm487_vm1, %v1647_v37, %v1648_v25 }
  0xb9   : > { %v1176_v51 = vadd.f32 %v1090_v44, %v931_v9  ;;  %v339_v31 = vmul.f32 %v3583_v38, %v3513_v10  ;;  %v978_v23 = vmul.f32 %v3599_v20, %v3691_v55  ;;  %v1223_v43 = vmul.f32 %v3614_v16, %v3691_v55 }
  0xba   : > { %v531_v15 = vrot.slane %v417_v41, 1  ;;  %v777_v61 = vrot.slane %v663_v24, 2  ;;  %2747 = vmatmul.mubr.msk.f32.gmra.mrb[14].mxu0 %vm1997_vm3, %v1979_v63  ;;  %v1894_v1 = vsel %vm733_vm2, %v1892_v58, %v1893_v0  ;;  %v1537_v48 = vmul.f32 %v3622_v45, %v3769_v35 }
  0xbb   : > { %v1421_v8 = vadd.f32 %v1335_v56, %v1176_v51  ;;  %v1782_v10 = vmul.f32 %v3679_v18, %v3769_v35  ;;  %v1091_v27 = vrot.slane %v978_v23, 1  ;;  %v1336_v22 = vrot.slane %v1223_v43, 2 }
  0xbc   : > { %v532_v2 = vsel %vm487_vm1, %v529_v60, %v531_v15  ;;  %v778_v21 = vsel %vm733_vm2, %v775_v50, %v777_v61  ;;  %v900_v11 = vmul.f32 %v3607_v19, %v3644_v13  ;;  %v1650_v57 = vrot.slane %v1537_v48, 1 }
  0xbd   : > { %v1490_v30 = vadd.f32 %v1458_v5, %v1421_v8  ;;  %v617_v3 = vadd.f32 %v532_v2, %v339_v31  ;;  %v1092_v59 = vsel %vm487_vm1, %v1089_v12, %v1091_v27  ;;  %v1337_v26 = vsel %vm733_vm2, %v1334_v39, %v1336_v22  ;;  %v244_v27 = vld [vmem:[%s2982_s7 + $0x118] sm:$0x3] }
  0xbe   : > { %v1459_v14 = vmul.f32 %v3636_v54, %v3724_v40  ;;  %v1895_v60 = vrot.slane %v1782_v10, 2  ;;  %v3800_v52 = vmax.f32 %v242_v33, 0.0  ;;  %v3802_v49 = vmax.f32 %v243_v34, 0.0 }
  0xbf   : > { %v1735_v28 = vadd.f32 %v1649_v6, %v1490_v30  ;;  %v863_v50 = vadd.f32 %v778_v21, %v617_v3  ;;  %v1651_v32 = vsel %vm487_vm1, %v1648_v25, %v1650_v57  ;;  %v418_v17 = vmul.f32 %v3576_v29, %v3640_v42 }
  0xc0   : > { %v419_v12 = vmul.f32 %v3576_v29, %v3644_v13  ;;  %v664_v39 = vmul.f32 %v3590_v62, %v3640_v42  ;;  %v340_v53 = vmul.f32 %v3583_v38, %v3640_v42  ;;  %v665_v44 = vmul.f32 %v3590_v62, %v3644_v13 }
  0xc1   : > { %v1980_v47 = vadd.f32 %v1894_v1, %v1735_v28  ;;  %v932_v46 = vadd.f32 %v900_v11, %v863_v50  ;;  %v533_v5 = vrot.slane %v418_v17, 1  ;;  %v979_v7 = vmul.f32 %v3599_v20, %v3722_v4 }
  0xc2   : > { %v534_v37 = vrot.slane %v419_v12, 1  ;;  %v779_v25 = vrot.slane %v664_v39, 2  ;;  %v780_v58 = vrot.slane %v665_v44, 2  ;;  %v980_v56 = vmul.f32 %v3599_v20, %v3724_v40 }
  0xc3   : > { %2749 = vmatprep.mubr.msk.f32.mxu1 %vm1997_vm3, %v1980_v47  ;;  %v1177_v9 = vadd.f32 %v1092_v59, %v932_v46  ;;  %v1224_v41 = vmul.f32 %v3614_v16, %v3722_v4  ;;  %v901_v24 = vmul.f32 %v3607_v19, %v3722_v4  ;;  %v1093_v63 = vrot.slane %v979_v7, 1 }
  0xc4   : > { %v535_v42 = vsel %vm487_vm1, %v533_v5, %v534_v37  ;;  %v1225_v51 = vmul.f32 %v3614_v16, %v3724_v40  ;;  %v781_v15 = vsel %vm733_vm2, %v779_v25, %v780_v58  ;;  %v1094_v61 = vrot.slane %v980_v56, 1 }
  0xc5   : > { %v1422_v6 = vadd.f32 %v1337_v26, %v1177_v9  ;;  %v618_v31 = vadd.f32 %v535_v42, %v340_v53  ;;  %v1338_v23 = vrot.slane %v1224_v41, 2  ;;  %v1538_v8 = vmul.f32 %v3622_v45, %v3800_v52  ;;  %v245_v9 = vld [vmem:[%s2982_s7 + $0x120] sm:$0xff] }
  0xc6   : > { %v1339_v43 = vrot.slane %v1225_v51, 2  ;;  %v3832_v1 = vmul.f32 %v3622_v45, %v3802_v49  ;;  %v1896_v10 = vsel %vm733_vm2, %v1893_v0, %v1895_v60  ;;  %v1783_v21 = vmul.f32 %v3679_v18, %v3800_v52 }
  0xc7   : > { %v1491_v48 = vadd.f32 %v1459_v14, %v1422_v6  ;;  %v864_v2 = vadd.f32 %v781_v15, %v618_v31  ;;  %v1095_v22 = vsel %vm487_vm1, %v1093_v63, %v1094_v61  ;;  %v1652_v33 = vrot.slane %v1538_v8, 1  ;;  %v246_v63 = vld [vmem:[%s2982_s7 + $0x128] sm:$0xff] }
  0xc8   : > { %v1653_v34 = vrot.slane %v3832_v1, 1  ;;  %v3844_v30 = vmul.f32 %v3679_v18, %v3802_v49  ;;  %v1340_v36 = vsel %vm733_vm2, %v1338_v23, %v1339_v43  ;;  %v1460_v0 = vmul.f32 %v3636_v54, %v3800_v52 }
  0xc9   : > { %v1736_v3 = vadd.f32 %v1651_v32, %v1491_v48  ;;  %v933_v11 = vadd.f32 %v901_v24, %v864_v2  ;;  %v1897_v57 = vrot.slane %v1783_v21, 2  ;;  %v3850_v26 = vmax.f32 %v244_v27, 0.0 }
  0xca   : > { %v1898_v59 = vrot.slane %v3844_v30, 2  ;;  %v420_v14 = vmul.f32 %v3576_v29, %v3691_v55  ;;  %v341_v50 = vmul.f32 %v3583_v38, %v3644_v13  ;;  %v666_v32 = vmul.f32 %v3590_v62, %v3691_v55 }
  0xcb   : > { %v1981_v60 = vadd.f32 %v1896_v10, %v1736_v3  ;;  %v1178_v28 = vadd.f32 %v1095_v22, %v933_v11  ;;  %v1654_v17 = vsel %vm487_vm1, %v1652_v33, %v1653_v34  ;;  %v981_v39 = vmul.f32 %v3599_v20, %v3769_v35 }
  0xcc   : > { %v536_v12 = vrot.slane %v420_v14, 1  ;;  %v1226_v47 = vmul.f32 %v3614_v16, %v3769_v35  ;;  %v782_v53 = vrot.slane %v666_v32, 2  ;;  %v902_v13 = vmul.f32 %v3607_v19, %v3724_v40 }
  0xcd   : > { %2750 = vmatmul.mubr.msk.f32.vlgmr.msra.gmra.mrb[0].mxu1 %vm1997_vm3, %v1981_v60  ;;  %v1423_v46 = vadd.f32 %v1340_v36, %v1178_v28  ;;  %v1540_v55 = vmul.f32 %v3622_v45, %v3850_v26  ;;  %v1096_v5 = vrot.slane %v981_v39, 1  ;;  %v1785_v7 = vmul.f32 %v3679_v18, %v3850_v26 }
  0xce   : > { %v537_v44 = vsel %vm487_vm1, %v534_v37, %v536_v12  ;;  %v1341_v25 = vrot.slane %v1226_v47, 2  ;;  %v1899_v41 = vsel %vm733_vm2, %v1897_v57, %v1898_v59  ;;  %v783_v24 = vsel %vm733_vm2, %v780_v58, %v782_v53 }
  0xcf   : > { %v1492_v56 = vadd.f32 %v1460_v0, %v1423_v46  ;;  %v619_v42 = vadd.f32 %v537_v44, %v341_v50  ;;  %v1097_v51 = vsel %vm487_vm1, %v1094_v61, %v1096_v5  ;;  %v1461_v37 = vmul.f32 %v3636_v54, %v3802_v49 }
  0xd0   : > { %v1342_v6 = vsel %vm733_vm2, %v1339_v43, %v1341_v25  ;;  %v1655_v31 = vrot.slane %v1540_v55, 1  ;;  %v1900_v8 = vrot.slane %v1785_v7, 2  ;;  %v3883_v48 = vmax.f32 %v245_v9, 0.0  ;;  %v247_v9 = vld [vmem:[%s2982_s7 + $0x130] sm:$0x3] }
  0xd1   : > { %v1737_v15 = vadd.f32 %v1654_v17, %v1492_v56  ;;  %v865_v23 = vadd.f32 %v783_v24, %v619_v42  ;;  %v3885_v10 = vmax.f32 %v246_v63, 0.0  ;;  %v342_v2 = vmul.f32 %v3583_v38, %v3722_v4 }
  0xd2   : > { %v421_v58 = vmul.f32 %v3576_v29, %v3722_v4  ;;  %v422_v61 = vmul.f32 %v3576_v29, %v3724_v40  ;;  %v667_v27 = vmul.f32 %v3590_v62, %v3722_v4  ;;  %v668_v22 = vmul.f32 %v3590_v62, %v3724_v40 }
  0xd3   : > { %v1982_v43 = vadd.f32 %v1899_v41, %v1737_v15  ;;  %v934_v21 = vadd.f32 %v902_v13, %v865_v23  ;;  %v903_v11 = vmul.f32 %v3607_v19, %v3800_v52  ;;  %v982_v36 = vmul.f32 %v3599_v20, %v3800_v52 }
  0xd4   : > { %v538_v33 = vrot.slane %v421_v58, 1  ;;  %v539_v3 = vrot.slane %v422_v61, 1  ;;  %v784_v57 = vrot.slane %v667_v27, 2  ;;  %v785_v14 = vrot.slane %v668_v22, 2 }
  0xd5   : > { %2752 = vmatprep.mubr.msk.f32.mxu1 %vm1997_vm3, %v1982_v43  ;;  %v1179_v0 = vadd.f32 %v1097_v51, %v934_v21  ;;  %v983_v60 = vmul.f32 %v3599_v20, %v3802_v49  ;;  %v1098_v28 = vrot.slane %v982_v36, 1  ;;  %v1227_v50 = vmul.f32 %v3614_v16, %v3800_v52 }
  0xd6   : > { %v540_v4 = vsel %vm487_vm1, %v538_v33, %v539_v3  ;;  %v1228_v32 = vmul.f32 %v3614_v16, %v3802_v49  ;;  %v786_v39 = vsel %vm733_vm2, %v784_v57, %v785_v14  ;;  %v1656_v46 = vsel %vm487_vm1, %v1653_v34, %v1655_v31 }
  0xd7   : > { %v1424_v17 = vadd.f32 %v1342_v6, %v1179_v0  ;;  %v620_v12 = vadd.f32 %v540_v4, %v342_v2  ;;  %v1099_v47 = vrot.slane %v983_v60, 1  ;;  %v1343_v53 = vrot.slane %v1227_v50, 2  ;;  %v248_v0 = vld [vmem:[%s2982_s7 + $0x138] sm:$0xff]  ;;  %v249_v50 = vld [vmem:[%s2982_s7 + $0x140] sm:$0xff] }
  0xd8   : > { %v1344_v13 = vrot.slane %v1228_v32, 2  ;;  %v1541_v55 = vmul.f32 %v3622_v45, %v3883_v48  ;;  %v1901_v5 = vsel %vm733_vm2, %v1898_v59, %v1900_v8  ;;  %v1542_v7 = vmul.f32 %v3622_v45, %v3885_v10 }
  0xd9   : > { %v1493_v44 = vadd.f32 %v1461_v37, %v1424_v17  ;;  %v866_v25 = vadd.f32 %v786_v39, %v620_v12  ;;  %v1100_v56 = vsel %vm487_vm1, %v1098_v28, %v1099_v47  ;;  %v1786_v34 = vmul.f32 %v3679_v18, %v3883_v48 }
  0xda   : > { %v1657_v1 = vrot.slane %v1541_v55, 1  ;;  %v3926_v41 = vmul.f32 %v3679_v18, %v3885_v10  ;;  %v1462_v30 = vmul.f32 %v3636_v54, %v3883_v48  ;;  %v1658_v59 = vrot.slane %v1542_v7, 1 }
  0xdb   : > { %v1738_v42 = vadd.f32 %v1656_v46, %v1493_v44  ;;  %v935_v24 = vadd.f32 %v903_v11, %v866_v25  ;;  %v1345_v63 = vsel %vm733_vm2, %v1343_v53, %v1344_v13  ;;  %v1902_v51 = vrot.slane %v1786_v34, 2 }
  0xdc   : > { %v3931_v6 = vmax.f32 %v247_v9, 0.0  ;;  %v423_v37 = vmul.f32 %v3576_v29, %v3769_v35  ;;  %v343_v23 = vmul.f32 %v3583_v38, %v3724_v40  ;;  %v669_v8 = vmul.f32 %v3590_v62, %v3769_v35 }
  0xdd   : > { %v1983_v31 = vadd.f32 %v1901_v5, %v1738_v42  ;;  %v1180_v15 = vadd.f32 %v1100_v56, %v935_v24  ;;  %v1659_v2 = vsel %vm487_vm1, %v1657_v1, %v1658_v59  ;;  %v1903_v58 = vrot.slane %v3926_v41, 2 }
  0xde   : > { %v541_v61 = vrot.slane %v423_v37, 1  ;;  %v984_v43 = vmul.f32 %v3599_v20, %v3850_v26  ;;  %v787_v27 = vrot.slane %v669_v8, 2  ;;  %v904_v22 = vmul.f32 %v3607_v19, %v3802_v49 }
  0xdf   : > { %2753 = vmatmul.mubr.msk.f32.gmra.mrb[2].mxu1 %vm1997_vm3, %v1983_v31  ;;  %v1425_v21 = vadd.f32 %v1345_v63, %v1180_v15  ;;  %v1229_v40 = vmul.f32 %v3614_v16, %v3850_v26  ;;  %v1543_v11 = vmul.f32 %v3622_v45, %v3931_v6  ;;  %v1788_v36 = vmul.f32 %v3679_v18, %v3931_v6 }
  0xe0   : > { %v542_v35 = vsel %vm487_vm1, %v539_v3, %v541_v61  ;;  %v1101_v33 = vrot.slane %v984_v43, 1  ;;  %v788_v4 = vsel %vm733_vm2, %v785_v14, %v787_v27  ;;  %v1904_v32 = vsel %vm733_vm2, %v1902_v51, %v1903_v58 }
  0xe1   : > { %v1494_v57 = vadd.f32 %v1462_v30, %v1425_v21  ;;  %v621_v60 = vadd.f32 %v542_v35, %v343_v23  ;;  %v1346_v28 = vrot.slane %v1229_v40, 2  ;;  %v1463_v3 = vmul.f32 %v3636_v54, %v3885_v10 }
  0xe2   : > { %v1102_v17 = vsel %vm487_vm1, %v1099_v47, %v1101_v33  ;;  %v1660_v12 = vrot.slane %v1543_v11, 1  ;;  %v1905_v53 = vrot.slane %v1788_v36, 2  ;;  %v3960_v55 = vmax.f32 %v248_v0, 0.0 }
  0xe3   : > { %v1739_v39 = vadd.f32 %v1659_v2, %v1494_v57  ;;  %v867_v46 = vadd.f32 %v788_v4, %v621_v60  ;;  %v1347_v44 = vsel %vm733_vm2, %v1344_v13, %v1346_v28  ;;  %v3964_v14 = vmax.f32 %v249_v50, 0.0  ;;  %v250_v57 = vld [vmem:[%s2982_s7 + $0x148] sm:$0x3] }
  0xe4   : > { %v1661_v5 = vsel %vm487_vm1, %v1658_v59, %v1660_v12  ;;  %v424_v25 = vmul.f32 %v3576_v29, %v3800_v52  ;;  %v425_v9 = vmul.f32 %v3576_v29, %v3802_v49  ;;  %v670_v56 = vmul.f32 %v3590_v62, %v3800_v52 }
  0xe5   : > { %v1984_v7 = vadd.f32 %v1904_v32, %v1739_v39  ;;  %v936_v47 = vadd.f32 %v904_v22, %v867_v46  ;;  %v344_v1 = vmul.f32 %v3583_v38, %v3800_v52  ;;  %v671_v13 = vmul.f32 %v3590_v62, %v3802_v49 }
  0xe6   : > { %v543_v34 = vrot.slane %v424_v25, 1  ;;  %v985_v41 = vmul.f32 %v3599_v20, %v3883_v48  ;;  %v544_v24 = vrot.slane %v425_v9, 1  ;;  %v789_v30 = vrot.slane %v670_v56, 2 }
  0xe7   : > { %2755 = vmatprep.mubr.msk.f32.mxu1 %vm1997_vm3, %v1984_v7  ;;  %v1181_v42 = vadd.f32 %v1102_v17, %v936_v47  ;;  %v986_v59 = vmul.f32 %v3599_v20, %v3885_v10  ;;  %v790_v63 = vrot.slane %v671_v13, 2  ;;  %v905_v51 = vmul.f32 %v3607_v19, %v3883_v48 }
  0xe8   : > { %v1230_v52 = vmul.f32 %v3614_v16, %v3883_v48  ;;  %v1231_v37 = vmul.f32 %v3614_v16, %v3885_v10  ;;  %v545_v15 = vsel %vm487_vm1, %v543_v34, %v544_v24  ;;  %v1103_v23 = vrot.slane %v985_v41, 1  ;;  %v251_v41 = vld [vmem:[%s2982_s7 + $0x150] sm:$0xff] }
  0xe9   : > { %v1426_v31 = vadd.f32 %v1347_v44, %v1181_v42  ;;  %v1104_v8 = vrot.slane %v986_v59, 1  ;;  %v622_v2 = vadd.f32 %v545_v15, %v344_v1  ;;  %v791_v61 = vsel %vm733_vm2, %v789_v30, %v790_v63 }
  0xea   : > { %v1348_v43 = vrot.slane %v1230_v52, 2  ;;  %v1349_v21 = vrot.slane %v1231_v37, 2  ;;  %v1906_v22 = vsel %vm733_vm2, %v1903_v58, %v1905_v53  ;;  %v1544_v40 = vmul.f32 %v3622_v45, %v3960_v55  ;;  %v252_v52 = vld [vmem:[%s2982_s7 + $0x158] sm:$0xff] }
  0xeb   : > { %v1495_v27 = vadd.f32 %v1463_v3, %v1426_v31  ;;  %v1545_v35 = vmul.f32 %v3622_v45, %v3964_v14  ;;  %v868_v33 = vadd.f32 %v791_v61, %v622_v2  ;;  %v1464_v11 = vmul.f32 %v3636_v54, %v3960_v55 }
  0xec   : > { %v1789_v36 = vmul.f32 %v3679_v18, %v3960_v55  ;;  %v4000_v0 = vmul.f32 %v3679_v18, %v3964_v14  ;;  %v1105_v58 = vsel %vm487_vm1, %v1103_v23, %v1104_v8  ;;  %v1662_v4 = vrot.slane %v1544_v40, 1 }
  0xed   : > { %v1740_v60 = vadd.f32 %v1661_v5, %v1495_v27  ;;  %v1663_v28 = vrot.slane %v1545_v35, 1  ;;  %v937_v50 = vadd.f32 %v905_v51, %v868_v33  ;;  %v1350_v32 = vsel %vm733_vm2, %v1348_v43, %v1349_v21 }
  0xee   : > { %v1907_v17 = vrot.slane %v1789_v36, 2  ;;  %v1908_v3 = vrot.slane %v4000_v0, 2  ;;  %v4006_v39 = vmax.f32 %v250_v57, 0.0  ;;  %v426_v46 = vmul.f32 %v3576_v29, %v3850_v26 }
  0xef   : > { %v1985_v12 = vadd.f32 %v1906_v22, %v1740_v60  ;;  %v672_v53 = vmul.f32 %v3590_v62, %v3850_v26  ;;  %v1182_v44 = vadd.f32 %v1105_v58, %v937_v50  ;;  %v1664_v5 = vsel %vm487_vm1, %v1662_v4, %v1663_v28 }
  0xf0   : > { %v345_v25 = vmul.f32 %v3583_v38, %v3802_v49  ;;  %v987_v7 = vmul.f32 %v3599_v20, %v3931_v6  ;;  %v1909_v47 = vsel %vm733_vm2, %v1907_v17, %v1908_v3  ;;  %v546_v9 = vrot.slane %v426_v46, 1 }
  0xf1   : > { %2756 = vmatmul.mubr.msk.f32.gmra.mrb[4].mxu1 %vm1997_vm3, %v1985_v12  ;;  %v792_v56 = vrot.slane %v672_v53, 2  ;;  %v1232_v26 = vmul.f32 %v3614_v16, %v3931_v6  ;;  %v1427_v1 = vadd.f32 %v1350_v32, %v1182_v44  ;;  %v1546_v49 = vmul.f32 %v3622_v45, %v4006_v39 }
  0xf2   : > { %v1106_v34 = vrot.slane %v987_v7, 1  ;;  %v1791_v13 = vmul.f32 %v3679_v18, %v4006_v39  ;;  %v547_v42 = vsel %vm487_vm1, %v544_v24, %v546_v9  ;;  %v906_v59 = vmul.f32 %v3607_v19, %v3885_v10 }
  0xf3   : > { %v793_v30 = vsel %vm733_vm2, %v790_v63, %v792_v56  ;;  %v1351_v51 = vrot.slane %v1232_v26, 2  ;;  %v1496_v37 = vadd.f32 %v1464_v11, %v1427_v1  ;;  %v623_v31 = vadd.f32 %v547_v42, %v345_v25 }
  0xf4   : > { %v1465_v15 = vmul.f32 %v3636_v54, %v3964_v14  ;;  %v1665_v23 = vrot.slane %v1546_v49, 1  ;;  %v1107_v2 = vsel %vm487_vm1, %v1104_v8, %v1106_v34  ;;  %v1910_v43 = vrot.slane %v1791_v13, 2 }
  0xf5   : > { %v1352_v61 = vsel %vm733_vm2, %v1349_v21, %v1351_v51  ;;  %v4037_v27 = vmax.f32 %v251_v41, 0.0  ;;  %v1741_v24 = vadd.f32 %v1664_v5, %v1496_v37  ;;  %v869_v63 = vadd.f32 %v793_v30, %v623_v31  ;;  %v253_v30 = vld [vmem:[%s2982_s7 + $0x160] sm:$0x3] }
  0xf6   : > { %v4039_v22 = vmax.f32 %v252_v52, 0.0  ;;  %v427_v40 = vmul.f32 %v3576_v29, %v3883_v48  ;;  %v346_v35 = vmul.f32 %v3583_v38, %v3883_v48  ;;  %v428_v33 = vmul.f32 %v3576_v29, %v3885_v10 }
  0xf7   : > { %v673_v8 = vmul.f32 %v3590_v62, %v3883_v48  ;;  %v674_v21 = vmul.f32 %v3590_v62, %v3885_v10  ;;  %v1986_v11 = vadd.f32 %v1909_v47, %v1741_v24  ;;  %v938_v36 = vadd.f32 %v906_v59, %v869_v63 }
  0xf8   : > { %v1666_v57 = vsel %vm487_vm1, %v1663_v28, %v1665_v23  ;;  %v548_v60 = vrot.slane %v427_v40, 1  ;;  %v549_v58 = vrot.slane %v428_v33, 1  ;;  %v988_v32 = vmul.f32 %v3599_v20, %v3960_v55 }
  0xf9   : > { %v794_v4 = vrot.slane %v673_v8, 2  ;;  %v795_v50 = vrot.slane %v674_v21, 2  ;;  %2758 = vmatprep.mubr.msk.f32.mxu1 %vm1997_vm3, %v1986_v11  ;;  %v1183_v17 = vadd.f32 %v1107_v2, %v938_v36  ;;  %v989_v48 = vmul.f32 %v3599_v20, %v3964_v14 }
  0xfa   : > { %v1233_v12 = vmul.f32 %v3614_v16, %v3960_v55  ;;  %v1234_v46 = vmul.f32 %v3614_v16, %v3964_v14  ;;  %v550_v28 = vsel %vm487_vm1, %v548_v60, %v549_v58  ;;  %v907_v44 = vmul.f32 %v3607_v19, %v3960_v55 }
  0xfb   : > { %v796_v53 = vsel %vm733_vm2, %v794_v4, %v795_v50  ;;  %v1108_v5 = vrot.slane %v988_v32, 1  ;;  %v1428_v25 = vadd.f32 %v1352_v61, %v1183_v17  ;;  %v624_v7 = vadd.f32 %v550_v28, %v346_v35 }
  0xfc   : > { %v1109_v47 = vrot.slane %v989_v48, 1  ;;  %v1353_v9 = vrot.slane %v1233_v12, 2  ;;  %v1354_v56 = vrot.slane %v1234_v46, 2  ;;  %v1547_v26 = vmul.f32 %v3622_v45, %v4037_v27  ;;  %v254_v48 = vld [vmem:[%s2982_s7 + $0x168] sm:$0xff]  ;;  %v255_v12 = vld [vmem:[%s2982_s7 + $0x170] sm:$0xff] }
  0xfd   : > { %v1548_v1 = vmul.f32 %v3622_v45, %v4039_v22  ;;  %v1792_v34 = vmul.f32 %v3679_v18, %v4037_v27  ;;  %v1497_v49 = vadd.f32 %v1465_v15, %v1428_v25  ;;  %v1911_v13 = vsel %vm733_vm2, %v1908_v3, %v1910_v43 }
  0xfe   : > { %v870_v41 = vadd.f32 %v796_v53, %v624_v7  ;;  %v4076_v42 = vmul.f32 %v3679_v18, %v4039_v22  ;;  %v1110_v59 = vsel %vm487_vm1, %v1108_v5, %v1109_v47  ;;  %v1466_v51 = vmul.f32 %v3636_v54, %v4037_v27 }
  0xff   : > { %v1667_v52 = vrot.slane %v1547_v26, 1  ;;  %v1668_v37 = vrot.slane %v1548_v1, 1  ;;  %v1742_v31 = vadd.f32 %v1666_v57, %v1497_v49  ;;  %v1912_v15 = vrot.slane %v1792_v34, 2 }
 0x100   : > { %v939_v23 = vadd.f32 %v907_v44, %v870_v41  ;;  %v1913_v0 = vrot.slane %v4076_v42, 2  ;;  %v1355_v3 = vsel %vm733_vm2, %v1353_v9, %v1354_v56  ;;  %v4084_v2 = vmax.f32 %v253_v30, 0.0 }
 0x101   : > { %v429_v61 = vmul.f32 %v3576_v29, %v3931_v6  ;;  %v675_v43 = vmul.f32 %v3590_v62, %v3931_v6  ;;  %v1987_v24 = vadd.f32 %v1911_v13, %v1742_v31  ;;  %v1669_v40 = vsel %vm487_vm1, %v1667_v52, %v1668_v37 }
 0x102   : > { %v1184_v63 = vadd.f32 %v1110_v59, %v939_v23  ;;  %v347_v35 = vmul.f32 %v3583_v38, %v3885_v10  ;;  %v990_v21 = vmul.f32 %v3599_v20, %v4006_v39  ;;  %v1235_v11 = vmul.f32 %v3614_v16, %v4006_v39 }
 0x103   : > { %v551_v33 = vrot.slane %v429_v61, 1  ;;  %v797_v8 = vrot.slane %v675_v43, 2  ;;  %2759 = vmatmul.mubr.msk.f32.gmra.mrb[6].mxu1 %vm1997_vm3, %v1987_v24  ;;  %v1914_v36 = vsel %vm733_vm2, %v1912_v15, %v1913_v0  ;;  %v1549_v57 = vmul.f32 %v3622_v45, %v4084_v2 }
 0x104   : > { %v1429_v6 = vadd.f32 %v1355_v3, %v1184_v63  ;;  %v1794_v10 = vmul.f32 %v3679_v18, %v4084_v2  ;;  %v1111_v32 = vrot.slane %v990_v21, 1  ;;  %v1356_v17 = vrot.slane %v1235_v11, 2 }
 0x105   : > { %v552_v60 = vsel %vm487_vm1, %v549_v58, %v551_v33  ;;  %v798_v4 = vsel %vm733_vm2, %v795_v50, %v797_v8  ;;  %v908_v53 = vmul.f32 %v3607_v19, %v3964_v14  ;;  %v1670_v44 = vrot.slane %v1549_v57, 1 }
 0x106   : > { %v1498_v46 = vadd.f32 %v1466_v51, %v1429_v6  ;;  %v625_v28 = vadd.f32 %v552_v60, %v347_v35  ;;  %v1112_v45 = vsel %vm487_vm1, %v1109_v47, %v1111_v32  ;;  %v1357_v5 = vsel %vm733_vm2, %v1354_v56, %v1356_v17  ;;  %v4202_v17 = vld [vmem:[%s4648_s1 + $0x6] ss:$0 sm:$0xff] }
 0x107   : > { %v1467_v58 = vmul.f32 %v3636_v54, %v4039_v22  ;;  %v1915_v25 = vrot.slane %v1794_v10, 2  ;;  %v4115_v9 = vmax.f32 %v254_v48, 0.0  ;;  %v4117_v26 = vmax.f32 %v255_v12, 0.0 }
 0x108   : > { %v1743_v50 = vadd.f32 %v1669_v40, %v1498_v46  ;;  %v871_v7 = vadd.f32 %v798_v4, %v625_v28  ;;  %v1671_v1 = vsel %vm487_vm1, %v1668_v37, %v1670_v44  ;;  %v430_v34 = vmul.f32 %v3576_v29, %v3960_v55 }
 0x109   : > { %v4124_v47 = vmul.f32 %v3576_v29, %v3964_v14  ;;  %v676_v56 = vmul.f32 %v3590_v62, %v3960_v55  ;;  %v348_v13 = vmul.f32 %v3583_v38, %v3960_v55  ;;  %v4133_v41 = vmul.f32 %v3590_v62, %v3964_v14 }
 0x10a   : > { %v1988_v54 = vadd.f32 %v1914_v36, %v1743_v50  ;;  %v940_v49 = vadd.f32 %v908_v53, %v871_v7  ;;  %v553_v30 = vrot.slane %v430_v34, 1  ;;  %v991_v29 = vmul.f32 %v3599_v20, %v4037_v27  ;;  %v256_v36 = vld [vmem:[%s2982_s7 + $0x178] sm:$0x3]  ;;  %v4212_v53 = vld [vmem:[%s4648_s1 + $0x1] ss:$0 sm:$0xff] }
 0x10b   : > { %v554_v59 = vrot.slane %v4124_v47, 1  ;;  %v799_v51 = vrot.slane %v676_v56, 2  ;;  %v800_v37 = vrot.slane %v4133_v41, 2  ;;  %v4142_v31 = vmul.f32 %v3599_v20, %v4039_v22  ;;  %v4226_v50 = vld [vmem:[%s4648_s1 + $0x2] ss:$0 sm:$0xff] }
 0x10c   : > { %2761 = vmatprep.mubr.msk.f32.mxu1 %vm1997_vm3, %v1988_v54  ;;  %v1185_v52 = vadd.f32 %v1112_v45, %v940_v49  ;;  %v1236_v38 = vmul.f32 %v3614_v16, %v4037_v27  ;;  %v909_v55 = vmul.f32 %v3607_v19, %v4037_v27  ;;  %v1113_v23 = vrot.slane %v991_v29, 1  ;;  %v4236_v56 = vld [vmem:[%s4648_s1 + $0x4] ss:$0 sm:$0xff]  ;;  %v4243_v54 = vld [vmem:[%s4648_s1 + $0x5] ss:$0 sm:$0xff] }
 0x10d   : > { %v555_v62 = vsel %vm487_vm1, %v553_v30, %v554_v59  ;;  %v4158_v20 = vmul.f32 %v3614_v16, %v4039_v22  ;;  %v801_v61 = vsel %vm733_vm2, %v799_v51, %v800_v37  ;;  %v1114_v43 = vrot.slane %v4142_v31, 1  ;;  %v4170_v16 = vld [vmem:[%s4648_s1 + $0x7] ss:$0 sm:$0xff]  ;;  %v4251_v30 = vld [vmem:[%s4648_s1 + $0x3] ss:$0 sm:$0xff] }
 0x10e   : > { %v1430_v15 = vadd.f32 %v1357_v5, %v1185_v52  ;;  %v626_v3 = vadd.f32 %v555_v62, %v348_v13  ;;  %v4164_v24 = vpop.f32.mrb[0].mxu0  ;;  %v1358_v63 = vrot.slane %v1236_v38, 2  ;;  %v1550_v40 = vmul.f32 %v4170_v16, %v4115_v9 }
 0x10f   : > { %v1359_v19 = vrot.slane %v4158_v20, 2  ;;  %v4176_v35 = vmul.f32 %v4170_v16, %v4117_v26  ;;  %2324 = vst.msk [vmem:[%s4149_s22 + $0x8] sm:$0xff] %vm1997_vm3, %v4164_v24  ;;  %v4181_v33 = vpop.f32.mrb[1].mxu0  ;;  %v1916_v21 = vsel %vm733_vm2, %v1913_v0, %v1915_v25  ;;  %v1795_v6 = vmul.f32 %v3679_v18, %v4115_v9 }
 0x110   : > { %v1499_v8 = vadd.f32 %v1467_v58, %v1430_v15  ;;  %v872_v11 = vadd.f32 %v801_v61, %v626_v3  ;;  %2323 = vst.msk [vmem:[%s4149_s22] sm:$0xff] %vm1997_vm3, %v4181_v33  ;;  %v1115_v57 = vsel %vm487_vm1, %v1113_v23, %v1114_v43  ;;  %v1672_v10 = vrot.slane %v1550_v40, 1  ;;  %v4219_v58 = vld [vmem:[%s4648_s1] ss:$0 sm:$0xff]  ;;  %v258_v61 = vld [vmem:[%s2982_s7 + $0x188] sm:$0xff] }
 0x111   : > { %v1673_v60 = vrot.slane %v4176_v35, 1  ;;  %v4196_v4 = vmul.f32 %v3679_v18, %v4117_v26  ;;  %v1360_v0 = vsel %vm733_vm2, %v1358_v63, %v1359_v19  ;;  %v1468_v48 = vmul.f32 %v4202_v17, %v4115_v9 }
 0x112   : > { %v1744_v42 = vadd.f32 %v1671_v1, %v1499_v8  ;;  %v941_v32 = vadd.f32 %v909_v55, %v872_v11  ;;  %v1917_v12 = vrot.slane %v1795_v6, 2  ;;  %v4207_v28 = vmax.f32 %v256_v36, 0.0  ;;  %v257_v55 = vld [vmem:[%s2982_s7 + $0x180] sm:$0xff] }
 0x113   : > { %v1918_v46 = vrot.slane %v4196_v4, 2  ;;  %v432_v44 = vmul.f32 %v4212_v53, %v4006_v39  ;;  %v349_v25 = vmul.f32 %v4219_v58, %v3964_v14  ;;  %v678_v7 = vmul.f32 %v4226_v50, %v4006_v39 }
 0x114   : > { %v1989_v45 = vadd.f32 %v1916_v21, %v1744_v42  ;;  %v1186_v5 = vadd.f32 %v1115_v57, %v941_v32  ;;  %v1674_v1 = vsel %vm487_vm1, %v1672_v10, %v1673_v60  ;;  %v993_v14 = vmul.f32 %v4236_v56, %v4084_v2 }
 0x115   : > { %v556_v34 = vrot.slane %v432_v44, 1  ;;  %v1238_v39 = vmul.f32 %v4243_v54, %v4084_v2  ;;  %v802_v13 = vrot.slane %v678_v7, 2  ;;  %v910_v51 = vmul.f32 %v4251_v30, %v4039_v22 }
 0x116   : > { %2762 = vmatmul.mubr.msk.f32.gmra.mrb[8].mxu1 %vm1997_vm3, %v1989_v45  ;;  %v1431_v49 = vadd.f32 %v1360_v0, %v1186_v5  ;;  %v1552_v29 = vmul.f32 %v4170_v16, %v4207_v28  ;;  %v1116_v31 = vrot.slane %v993_v14, 1  ;;  %v1797_v62 = vmul.f32 %v3679_v18, %v4207_v28 }
 0x117   : > { %v557_v52 = vsel %vm487_vm1, %v554_v59, %v556_v34  ;;  %v1361_v38 = vrot.slane %v1238_v39, 2  ;;  %v1919_v20 = vsel %vm733_vm2, %v1917_v12, %v1918_v46  ;;  %v803_v3 = vsel %vm733_vm2, %v800_v37, %v802_v13 }
 0x118   : > { %v1500_v23 = vadd.f32 %v1468_v48, %v1431_v49  ;;  %v627_v15 = vadd.f32 %v557_v52, %v349_v25  ;;  %v1117_v47 = vsel %vm487_vm1, %v1114_v43, %v1116_v31  ;;  %v1469_v63 = vmul.f32 %v4202_v17, %v4117_v26 }
 0x119   : > { %v1362_v59 = vsel %vm733_vm2, %v1359_v19, %v1361_v38  ;;  %v1675_v18 = vrot.slane %v1552_v29, 1  ;;  %v1920_v21 = vrot.slane %v1797_v62, 2  ;;  %v4274_v11 = vmax.f32 %v257_v55, 0.0 }
 0x11a   : > { %v1745_v40 = vadd.f32 %v1674_v1, %v1500_v23  ;;  %v873_v8 = vadd.f32 %v803_v3, %v627_v15  ;;  %v4276_v6 = vmax.f32 %v258_v61, 0.0  ;;  %v350_v41 = vmul.f32 %v4219_v58, %v4037_v27  ;;  %v4335_v3 = vld [vmem:[%s4648_s1 + $0x8] ss:$0 sm:$0xff] }
 0x11b   : > { %v433_v37 = vmul.f32 %v4212_v53, %v4037_v27  ;;  %v4284_v43 = vmul.f32 %v4212_v53, %v4039_v22  ;;  %v679_v57 = vmul.f32 %v4226_v50, %v4037_v27  ;;  %v4290_v10 = vmul.f32 %v4226_v50, %v4039_v22 }
 0x11c   : > { %v1990_v19 = vadd.f32 %v1919_v20, %v1745_v40  ;;  %v942_v36 = vadd.f32 %v910_v51, %v873_v8  ;;  %v911_v0 = vmul.f32 %v4251_v30, %v4115_v9  ;;  %v994_v48 = vmul.f32 %v4236_v56, %v4115_v9 }
 0x11d   : > { %v558_v42 = vrot.slane %v433_v37, 1  ;;  %v559_v32 = vrot.slane %v4284_v43, 1  ;;  %v804_v44 = vrot.slane %v679_v57, 2  ;;  %v805_v27 = vrot.slane %v4290_v10, 2 }
 0x11e   : > { %2764 = vmatprep.mubr.msk.f32.mxu1 %vm1997_vm3, %v1990_v19  ;;  %v1187_v12 = vadd.f32 %v1117_v47, %v942_v36  ;;  %v995_v45 = vmul.f32 %v4236_v56, %v4117_v26  ;;  %v1118_v25 = vrot.slane %v994_v48, 1  ;;  %v1239_v7 = vmul.f32 %v4243_v54, %v4115_v9 }
 0x11f   : > { %v560_v5 = vsel %vm487_vm1, %v558_v42, %v559_v32  ;;  %v4306_v1 = vmul.f32 %v4243_v54, %v4117_v26  ;;  %v806_v39 = vsel %vm733_vm2, %v804_v44, %v805_v27  ;;  %v1676_v51 = vsel %vm487_vm1, %v1673_v60, %v1675_v18  ;;  %v259_v60 = vld [vmem:[%s2982_s7 + $0x190] sm:$0x3] }
 0x120   : > { %v1432_v34 = vadd.f32 %v1362_v59, %v1187_v12  ;;  %v628_v14 = vadd.f32 %v560_v5, %v350_v41  ;;  %v1119_v49 = vrot.slane %v995_v45, 1  ;;  %v4309_v13 = vpop.f32.mrb[2].mxu0  ;;  %v1363_v29 = vrot.slane %v1239_v7, 2 }
 0x121   : > { %v1364_v52 = vrot.slane %v4306_v1, 2  ;;  %v1553_v31 = vmul.f32 %v4170_v16, %v4274_v11  ;;  %2326 = vst.msk [vmem:[%s4149_s22 + $0x18] sm:$0xff] %vm1997_vm3, %v4309_v13  ;;  %v4320_v38 = vpop.f32.mrb[3].mxu0  ;;  %v1921_v55 = vsel %vm733_vm2, %v1918_v46, %v1920_v21  ;;  %v1554_v35 = vmul.f32 %v4170_v16, %v4276_v6 }
 0x122   : > { %v1501_v62 = vadd.f32 %v1469_v63, %v1432_v34  ;;  %v874_v23 = vadd.f32 %v806_v39, %v628_v14  ;;  %2325 = vst.msk [vmem:[%s4149_s22 + $0x10] sm:$0xff] %vm1997_vm3, %v4320_v38  ;;  %v1120_v20 = vsel %vm487_vm1, %v1118_v25, %v1119_v49  ;;  %v1798_v4 = vmul.f32 %v4335_v3, %v4274_v11  ;;  %v260_v25 = vld [vmem:[%s2982_s7 + $0x198] sm:$0xff]  ;;  %v261_v39 = vld [vmem:[%s2982_s7 + $0x1a0] sm:$0xff] }
 0x123   : > { %v1677_v15 = vrot.slane %v1553_v31, 1  ;;  %v4341_v46 = vmul.f32 %v4335_v3, %v4276_v6  ;;  %v1470_v59 = vmul.f32 %v4202_v17, %v4274_v11  ;;  %v1678_v63 = vrot.slane %v1554_v35, 1 }
 0x124   : > { %v1746_v61 = vadd.f32 %v1676_v51, %v1501_v62  ;;  %v943_v47 = vadd.f32 %v911_v0, %v874_v23  ;;  %v1365_v18 = vsel %vm733_vm2, %v1363_v29, %v1364_v52  ;;  %v1922_v40 = vrot.slane %v1798_v4, 2 }
 0x125   : > { %v4346_v8 = vmax.f32 %v259_v60, 0.0  ;;  %v435_v21 = vmul.f32 %v4212_v53, %v4084_v2  ;;  %v351_v43 = vmul.f32 %v4219_v58, %v4039_v22  ;;  %v681_v19 = vmul.f32 %v4226_v50, %v4084_v2 }
 0x126   : > { %v1991_v41 = vadd.f32 %v1921_v55, %v1746_v61  ;;  %v1188_v37 = vadd.f32 %v1120_v20, %v943_v47  ;;  %v1679_v36 = vsel %vm487_vm1, %v1677_v15, %v1678_v63  ;;  %v1923_v57 = vrot.slane %v4341_v46, 2 }
 0x127   : > { %v561_v10 = vrot.slane %v435_v21, 1  ;;  %v996_v42 = vmul.f32 %v4236_v56, %v4207_v28  ;;  %v807_v48 = vrot.slane %v681_v19, 2  ;;  %v912_v12 = vmul.f32 %v4251_v30, %v4117_v26 }
 0x128   : > { %2765 = vmatmul.mubr.msk.f32.gmra.mrb[10].mxu1 %vm1997_vm3, %v1991_v41  ;;  %v1433_v0 = vadd.f32 %v1365_v18, %v1188_v37  ;;  %v1241_v22 = vmul.f32 %v4243_v54, %v4207_v28  ;;  %v1555_v45 = vmul.f32 %v4170_v16, %v4346_v8  ;;  %v1800_v5 = vmul.f32 %v4335_v3, %v4346_v8 }
 0x129   : > { %v562_v2 = vsel %vm487_vm1, %v559_v32, %v561_v10  ;;  %v1121_v44 = vrot.slane %v996_v42, 1  ;;  %v808_v34 = vsel %vm733_vm2, %v805_v27, %v807_v48  ;;  %v1924_v51 = vsel %vm733_vm2, %v1922_v40, %v1923_v57 }
 0x12a   : > { %v1502_v7 = vadd.f32 %v1470_v59, %v1433_v0  ;;  %v629_v1 = vadd.f32 %v562_v2, %v351_v43  ;;  %v1366_v14 = vrot.slane %v1241_v22, 2  ;;  %v1471_v29 = vmul.f32 %v4202_v17, %v4276_v6 }
 0x12b   : > { %v1122_v32 = vsel %vm487_vm1, %v1119_v49, %v1121_v44  ;;  %v1680_v31 = vrot.slane %v1555_v45, 1  ;;  %v1925_v23 = vrot.slane %v1800_v5, 2  ;;  %v314_v35 = vmax.f32 %v260_v25, 0.0 }
 0x12c   : > { %v1747_v62 = vadd.f32 %v1679_v36, %v1502_v7  ;;  %v875_v55 = vadd.f32 %v808_v34, %v629_v1  ;;  %v1367_v60 = vsel %vm733_vm2, %v1364_v52, %v1366_v14  ;;  %v4379_v20 = vmax.f32 %v261_v39, 0.0  ;;  %v262_v39 = vld [vmem:[%s2982_s7 + $0x1a8] sm:$0x3]  ;;  %s196_s7 = sand.u32 1, %s2887_s16  }
 0x12d   : > { %v1681_v27 = vsel %vm487_vm1, %v1678_v63, %v1680_v31  ;;  %v436_v15 = vmul.f32 %v4212_v53, %v4115_v9  ;;  %v437_v49 = vmul.f32 %v4212_v53, %v4117_v26  ;;  %v682_v47 = vmul.f32 %v4226_v50, %v4115_v9  ;;  %s2535_s11 = scalar_lea.sflag [#allocation3], %s196_s7 }
 0x12e   : > { %v1992_v4 = vadd.f32 %v1924_v51, %v1747_v62  ;;  %v944_v61 = vadd.f32 %v912_v12, %v875_v55  ;;  %v352_v59 = vmul.f32 %v4219_v58, %v4115_v9  ;;  %v683_v52 = vmul.f32 %v4226_v50, %v4117_v26 }
 0x12f   : > { %v563_v18 = vrot.slane %v436_v15, 1  ;;  %v997_v63 = vmul.f32 %v4236_v56, %v4274_v11  ;;  %v564_v21 = vrot.slane %v437_v49, 1  ;;  %v809_v41 = vrot.slane %v682_v47, 2 }
 0x130   : > { %2767 = vmatprep.mubr.msk.f32.mxu1 %vm1997_vm3, %v1992_v4  ;;  %v1189_v40 = vadd.f32 %v1122_v32, %v944_v61  ;;  %v4396_v37 = vmul.f32 %v4236_v56, %v4276_v6  ;;  %v810_v43 = vrot.slane %v683_v52, 2  ;;  %v913_v9 = vmul.f32 %v4251_v30, %v4274_v11 }
 0x131   : > { %v1242_v19 = vmul.f32 %v4243_v54, %v4274_v11  ;;  %v4404_v36 = vmul.f32 %v4243_v54, %v4276_v6  ;;  %v565_v42 = vsel %vm487_vm1, %v563_v18, %v564_v21  ;;  %v1123_v0 = vrot.slane %v997_v63, 1 }
 0x132   : > { %v1434_v10 = vadd.f32 %v1367_v60, %v1189_v40  ;;  %v1124_v48 = vrot.slane %v4396_v37, 1  ;;  %v4408_v12 = vpop.f32.mrb[4].mxu0  ;;  %v630_v22 = vadd.f32 %v565_v42, %v352_v59  ;;  %v811_v2 = vsel %vm733_vm2, %v809_v41, %v810_v43 }
 0x133   : > { %v1368_v44 = vrot.slane %v1242_v19, 2  ;;  %v1369_v11 = vrot.slane %v4404_v36, 2  ;;  %2328 = vst.msk [vmem:[%s4149_s22 + $0x28] sm:$0xff] %vm1997_vm3, %v4408_v12  ;;  %v4415_v45 = vpop.f32.mrb[5].mxu0  ;;  %v1556_v25 = vmul.f32 %v4170_v16, %v314_v35  ;;  %v4420_v7 = vmul.f32 %v4170_v16, %v4379_v20 }
 0x134   : > { %v1503_v5 = vadd.f32 %v1471_v29, %v1434_v10  ;;  %2327 = vst.msk [vmem:[%s4149_s22 + $0x20] sm:$0xff] %vm1997_vm3, %v4415_v45  ;;  %v1926_v1 = vsel %vm733_vm2, %v1923_v57, %v1925_v23  ;;  %v876_v34 = vadd.f32 %v811_v2, %v630_v22  ;;  %v1801_v14 = vmul.f32 %v4335_v3, %v314_v35 }
 0x135   : > { %v1125_v32 = vsel %vm487_vm1, %v1123_v0, %v1124_v48  ;;  %v1472_v29 = vmul.f32 %v4202_v17, %v314_v35  ;;  %v4434_v31 = vmul.f32 %v4335_v3, %v4379_v20  ;;  %v1370_v55 = vsel %vm733_vm2, %v1368_v44, %v1369_v11 }
 0x136   : > { %v1748_v51 = vadd.f32 %v1681_v27, %v1503_v5  ;;  %v945_v62 = vadd.f32 %v913_v9, %v876_v34  ;;  %v1682_v60 = vrot.slane %v1556_v25, 1  ;;  %v1683_v46 = vrot.slane %v4420_v7, 1 }
 0x137   : > { %v316_v23 = vmax.f32 %v262_v39, 0.0  ;;  %v438_v15 = vmul.f32 %v4212_v53, %v4207_v28  ;;  %v684_v27 = vmul.f32 %v4226_v50, %v4207_v28  ;;  %v1927_v35 = vrot.slane %v1801_v14, 2 }
 0x138   : > { %v1993_v57 = vadd.f32 %v1926_v1, %v1748_v51  ;;  %v1190_v4 = vadd.f32 %v1125_v32, %v945_v62  ;;  %v353_v61 = vmul.f32 %v4219_v58, %v4117_v26  ;;  %v999_v49 = vmul.f32 %v4236_v56, %v4346_v8 }
 0x139   : > { %v1928_v47 = vrot.slane %v4434_v31, 2  ;;  %v566_v59 = vrot.slane %v438_v15, 1  ;;  %v812_v18 = vrot.slane %v684_v27, 2  ;;  %v1244_v53 = vmul.f32 %v4243_v54, %v4346_v8 }
 0x13a   : > { %2768 = vmatmul.mubr.msk.f32.gmra.mrb[12].mxu1 %vm1997_vm3, %v1993_v57  ;;  %v1435_v52 = vadd.f32 %v1370_v55, %v1190_v4  ;;  %v1684_v28 = vsel %vm487_vm1, %v1682_v60, %v1683_v46  ;;  %v1126_v50 = vrot.slane %v999_v49, 1  ;;  %v1558_v58 = vmul.f32 %v4170_v16, %v316_v23 }
 0x13b   : > { %v567_v63 = vsel %vm487_vm1, %v564_v21, %v566_v59  ;;  %v813_v26 = vsel %vm733_vm2, %v810_v43, %v812_v18  ;;  %v2356_v56 = vsel %vm1997_vm3, %v4164_v24, 0.0  ;;  %v914_v37 = vmul.f32 %v4251_v30, %v4276_v6 }
 0x13c   : > { %v1504_v40 = vadd.f32 %v1472_v29, %v1435_v52  ;;  %v631_v41 = vadd.f32 %v567_v63, %v353_v61  ;;  %v1371_v9 = vrot.slane %v1244_v53, 2  ;;  %v1929_v54 = vsel %vm733_vm2, %v1927_v35, %v1928_v47 }
 0x13d   : > { %v1473_v8 = vmul.f32 %v4202_v17, %v4379_v20  ;;  %v2425_v21 = vmul.f32 %v4164_v24, %v4164_v24  ;;  %v2355_v16 = vsel %vm1997_vm3, %v4181_v33, 0.0  ;;  %v1803_v36 = vmul.f32 %v4335_v3, %v316_v23 }
 0x13e   : > { %v1749_v43 = vadd.f32 %v1684_v28, %v1504_v40  ;;  %v877_v19 = vadd.f32 %v813_v26, %v631_v41  ;;  %v2357_v10 = vadd.f32 %v2356_v56, %v2355_v16  ;;  %v1127_v42 = vsel %vm487_vm1, %v1124_v48, %v1126_v50 }
 0x13f   : > { %v1685_v30 = vrot.slane %v1558_v58, 1  ;;  %v2457_v6 = vsel %vm1997_vm3, %v2425_v21, 0.0  ;;  %v2424_v0 = vmul.f32 %v4181_v33, %v4181_v33  ;;  %v1372_v24 = vsel %vm733_vm2, %v1369_v11, %v1371_v9 }
 0x140   : > { %v1994_v17 = vadd.f32 %v1929_v54, %v1749_v43  ;;  %v946_v20 = vadd.f32 %v914_v37, %v877_v19  ;;  %v2358_v22 = vsel %vm1997_vm3, %v4320_v38, 0.0  ;;  %v2427_v3 = vmul.f32 %v4309_v13, %v4309_v13 }
 0x141   : > { %v2456_v2 = vsel %vm1997_vm3, %v2424_v0, 0.0  ;;  %v2359_v44 = vadd.f32 %v2358_v22, %v2357_v10  ;;  %v2426_v48 = vmul.f32 %v4320_v38, %v4320_v38  ;;  %v1930_v33 = vrot.slane %v1803_v36, 2 }
 0x142   : > { %2770 = vmatprep.mubr.msk.f32.mxu1 %vm1997_vm3, %v1994_v17  ;;  %v1191_v5 = vadd.f32 %v1127_v42, %v946_v20  ;;  %v2458_v25 = vadd.f32 %v2457_v6, %v2456_v2  ;;  %v2360_v11 = vsel %vm1997_vm3, %v4309_v13, 0.0  ;;  %v2362_v34 = vsel %vm1997_vm3, %v4415_v45, 0.0 }
 0x143   : > { %v2459_v7 = vsel %vm1997_vm3, %v2426_v48, 0.0  ;;  %v2361_v1 = vadd.f32 %v2360_v11, %v2359_v44  ;;  %v2428_v14 = vmul.f32 %v4415_v45, %v4415_v45  ;;  %v1686_v39 = vsel %vm487_vm1, %v1683_v46, %v1685_v30 }
 0x144   : > { %v1436_v38 = vadd.f32 %v1372_v24, %v1191_v5  ;;  %v2460_v51 = vadd.f32 %v2459_v7, %v2458_v25  ;;  %v2364_v32 = vsel %vm1997_vm3, %v4408_v12, 0.0  ;;  %v2736_v29 = vpop.f32.mrb[6].mxu0  ;;  %v2461_v13 = vsel %vm1997_vm3, %v2427_v3, 0.0 }
 0x145   : > { %v2429_v31 = vmul.f32 %v4408_v12, %v4408_v12  ;;  %v2363_v62 = vadd.f32 %v2362_v34, %v2361_v1  ;;  %v2463_v55 = vsel %vm1997_vm3, %v2428_v14, 0.0  ;;  %2330 = vst.msk [vmem:[%s4149_s22 + $0x38] sm:$0xff] %vm1997_vm3, %v2736_v29  ;;  %v2194_v60 = vpop.f32.mrb[7].mxu0  ;;  %v1931_v15 = vsel %vm733_vm2, %v1928_v47, %v1930_v33 }
 0x146   : > { %v1505_v45 = vadd.f32 %v1473_v8, %v1436_v38  ;;  %v2462_v57 = vadd.f32 %v2461_v13, %v2460_v51  ;;  %2329 = vst.msk [vmem:[%s4149_s22 + $0x30] sm:$0xff] %vm1997_vm3, %v2194_v60  ;;  %v2366_v46 = vsel %vm1997_vm3, %v2194_v60, 0.0  ;;  %v2430_v23 = vmul.f32 %v2194_v60, %v2194_v60 }
 0x147   : > { %v2365_v27 = vadd.f32 %v2364_v32, %v2363_v62  ;;  %v2465_v12 = vsel %vm1997_vm3, %v2429_v31, 0.0  ;;  %v2431_v61 = vmul.f32 %v2736_v29, %v2736_v29  ;;  %v2368_v53 = vsel %vm1997_vm3, %v2736_v29, 0.0 }
 0x148   : > { %v1750_v4 = vadd.f32 %v1686_v39, %v1505_v45  ;;  %v2464_v35 = vadd.f32 %v2463_v55, %v2462_v57  ;;  %v2467_v59 = vsel %vm1997_vm3, %v2430_v23, 0.0 }
 0x149   : > { %v2367_v49 = vadd.f32 %v2366_v46, %v2365_v27  ;;  %v2469_v47 = vsel %vm1997_vm3, %v2431_v61, 0.0 }
 0x14a   : > { %v1995_v18 = vadd.f32 %v1931_v15, %v1750_v4  ;;  %v2466_v52 = vadd.f32 %v2465_v12, %v2464_v35 }
 0x14b   : > { %v2369_v28 = vadd.f32 %v2368_v53, %v2367_v49 }
 0x14c   : > { %2771 = vmatmul.mubr.msk.f32.gmra.mrb[14].mxu1 %vm1997_vm3, %v1995_v18  ;;  %v2468_v50 = vadd.f32 %v2467_v59, %v2466_v52 }
 0x14e   : > { %v2470_v63 = vadd.f32 %v2469_v47, %v2468_v50 }
 0x157   : > { %v2739_v26 = vpop.f32.mrb[8].mxu0 }
 0x158   : > { %2332 = vst.msk [vmem:[%s4149_s22 + $0x48] sm:$0xff] %vm1997_vm3, %v2739_v26  ;;  %v2204_v58 = vpop.f32.mrb[9].mxu0  ;;  %v2433_v56 = vmul.f32 %v2739_v26, %v2739_v26  ;;  %v2372_v9 = vsel %vm1997_vm3, %v2739_v26, 0.0 }
 0x159   : > { %2331 = vst.msk [vmem:[%s4149_s22 + $0x40] sm:$0xff] %vm1997_vm3, %v2204_v58  ;;  %v2370_v40 = vsel %vm1997_vm3, %v2204_v58, 0.0  ;;  %v2432_v41 = vmul.f32 %v2204_v58, %v2204_v58 }
 0x15a   : > { %v2371_v37 = vadd.f32 %v2370_v40, %v2369_v28  ;;  %v2473_v16 = vsel %vm1997_vm3, %v2433_v56, 0.0 }
 0x15b   : > { %v2471_v54 = vsel %vm1997_vm3, %v2432_v41, 0.0 }
 0x15c   : > { %v2472_v8 = vadd.f32 %v2471_v54, %v2470_v63  ;;  %v2373_v21 = vadd.f32 %v2372_v9, %v2371_v37 }
 0x15e   : > { %v2474_v43 = vadd.f32 %v2473_v16, %v2472_v8 }
 0x169   : > { %v2742_v19 = vpop.f32.mrb[10].mxu0 }
 0x16a   : > { %2334 = vst.msk [vmem:[%s4149_s22 + $0x58] sm:$0xff] %vm1997_vm3, %v2742_v19  ;;  %v2214_v36 = vpop.f32.mrb[11].mxu0  ;;  %v2435_v10 = vmul.f32 %v2742_v19, %v2742_v19  ;;  %v2376_v0 = vsel %vm1997_vm3, %v2742_v19, 0.0 }
 0x16b   : > { %2333 = vst.msk [vmem:[%s4149_s22 + $0x50] sm:$0xff] %vm1997_vm3, %v2214_v36  ;;  %v2374_v42 = vsel %vm1997_vm3, %v2214_v36, 0.0  ;;  %v2434_v30 = vmul.f32 %v2214_v36, %v2214_v36 }
 0x16c   : > { %v2375_v6 = vadd.f32 %v2374_v42, %v2373_v21  ;;  %v2477_v22 = vsel %vm1997_vm3, %v2435_v10, 0.0 }
 0x16d   : > { %v2475_v17 = vsel %vm1997_vm3, %v2434_v30, 0.0 }
 0x16e   : > { %v2476_v20 = vadd.f32 %v2475_v17, %v2474_v43  ;;  %v2377_v24 = vadd.f32 %v2376_v0, %v2375_v6 }
 0x170   : > { %v2478_v2 = vadd.f32 %v2477_v22, %v2476_v20 }
 0x17b   : > { %v2745_v3 = vpop.f32.mrb[12].mxu0 }
 0x17c   : > { %2336 = vst.msk [vmem:[%s4149_s22 + $0x68] sm:$0xff] %vm1997_vm3, %v2745_v3  ;;  %v2224_v44 = vpop.f32.mrb[13].mxu0  ;;  %v2437_v48 = vmul.f32 %v2745_v3, %v2745_v3  ;;  %v2380_v11 = vsel %vm1997_vm3, %v2745_v3, 0.0 }
 0x17d   : > { %2335 = vst.msk [vmem:[%s4149_s22 + $0x60] sm:$0xff] %vm1997_vm3, %v2224_v44  ;;  %v2378_v5 = vsel %vm1997_vm3, %v2224_v44, 0.0  ;;  %v2436_v33 = vmul.f32 %v2224_v44, %v2224_v44 }
 0x17e   : > { %v2379_v25 = vadd.f32 %v2378_v5, %v2377_v24  ;;  %v2481_v14 = vsel %vm1997_vm3, %v2437_v48, 0.0 }
 0x17f   : > { %v2479_v7 = vsel %vm1997_vm3, %v2436_v33, 0.0 }
 0x180   : > { %v2480_v1 = vadd.f32 %v2479_v7, %v2478_v2  ;;  %v2381_v34 = vadd.f32 %v2380_v11, %v2379_v25 }
 0x182   : > { %v2482_v38 = vadd.f32 %v2481_v14, %v2480_v1 }
 0x18d   : > { %v2748_v39 = vpop.f32.mrb[14].mxu0 }
 0x18e   : > { %2338 = vst.msk [vmem:[%s4149_s22 + $0x78] sm:$0xff] %vm1997_vm3, %v2748_v39  ;;  %v2234_v51 = vpop.f32.mrb[15].mxu0  ;;  %v2439_v32 = vmul.f32 %v2748_v39, %v2748_v39  ;;  %v2384_v62 = vsel %vm1997_vm3, %v2748_v39, 0.0 }
 0x18f   : > { %2337 = vst.msk [vmem:[%s4149_s22 + $0x70] sm:$0xff] %vm1997_vm3, %v2234_v51  ;;  %v2382_v29 = vsel %vm1997_vm3, %v2234_v51, 0.0  ;;  %v2438_v13 = vmul.f32 %v2234_v51, %v2234_v51 }
 0x190   : > { %v2383_v31 = vadd.f32 %v2382_v29, %v2381_v34  ;;  %v2485_v57 = vsel %vm1997_vm3, %v2439_v32, 0.0 }
 0x191   : > { %v2483_v55 = vsel %vm1997_vm3, %v2438_v13, 0.0 }
 0x192   : > { %v2385_v60 = vadd.f32 %v2384_v62, %v2383_v31  ;;  %v2484_v45 = vadd.f32 %v2483_v55, %v2482_v38 }
 0x194   : > { %v2486_v46 = vadd.f32 %v2485_v57, %v2484_v45 }
 0x1a0   : > { %v2751_v23 = vpop.f32.mrb[0].mxu1 }
 0x1a1   : > { %2340 = vst.msk [vmem:[%s4149_s22 + $0x88] sm:$0xff] %vm1997_vm3, %v2751_v23  ;;  %v2244_v15 = vpop.f32.mrb[1].mxu1  ;;  %v2441_v27 = vmul.f32 %v2751_v23, %v2751_v23  ;;  %v2388_v61 = vsel %vm1997_vm3, %v2751_v23, 0.0 }
 0x1a2   : > { %2339 = vst.msk [vmem:[%s4149_s22 + $0x80] sm:$0xff] %vm1997_vm3, %v2244_v15  ;;  %v2386_v4 = vsel %vm1997_vm3, %v2244_v15, 0.0  ;;  %v2440_v35 = vmul.f32 %v2244_v15, %v2244_v15 }
 0x1a3   : > { %v2387_v12 = vadd.f32 %v2386_v4, %v2385_v60  ;;  %v2489_v53 = vsel %vm1997_vm3, %v2441_v27, 0.0 }
 0x1a4   : > { %v2487_v49 = vsel %vm1997_vm3, %v2440_v35, 0.0 }
 0x1a5   : > { %v2488_v59 = vadd.f32 %v2487_v49, %v2486_v46  ;;  %v2389_v18 = vadd.f32 %v2388_v61, %v2387_v12 }
 0x1a7   : > { %v2490_v52 = vadd.f32 %v2489_v53, %v2488_v59 }
 0x1b2   : > { %v2754_v28 = vpop.f32.mrb[2].mxu1 }
 0x1b3   : > { %2342 = vst.msk [vmem:[%s4149_s22 + $0x98] sm:$0xff] %vm1997_vm3, %v2754_v28  ;;  %v2254_v50 = vpop.f32.mrb[3].mxu1  ;;  %v2443_v47 = vmul.f32 %v2754_v28, %v2754_v28  ;;  %v2392_v56 = vsel %vm1997_vm3, %v2754_v28, 0.0 }
 0x1b4   : > { %2341 = vst.msk [vmem:[%s4149_s22 + $0x90] sm:$0xff] %vm1997_vm3, %v2254_v50  ;;  %v2390_v63 = vsel %vm1997_vm3, %v2254_v50, 0.0  ;;  %v2442_v26 = vmul.f32 %v2254_v50, %v2254_v50 }
 0x1b5   : > { %v2391_v58 = vadd.f32 %v2390_v63, %v2389_v18  ;;  %v2493_v9 = vsel %vm1997_vm3, %v2443_v47, 0.0 }
 0x1b6   : > { %v2491_v40 = vsel %vm1997_vm3, %v2442_v26, 0.0 }
 0x1b7   : > { %v2492_v41 = vadd.f32 %v2491_v40, %v2490_v52  ;;  %v2393_v37 = vadd.f32 %v2392_v56, %v2391_v58 }
 0x1b9   : > { %v2494_v54 = vadd.f32 %v2493_v9, %v2492_v41 }
 0x1c4   : > { %v2757_v8 = vpop.f32.mrb[4].mxu1 }
 0x1c5   : > { %2344 = vst.msk [vmem:[%s4149_s22 + $0xa8] sm:$0xff] %vm1997_vm3, %v2757_v8  ;;  %v2264_v21 = vpop.f32.mrb[5].mxu1  ;;  %v2445_v16 = vmul.f32 %v2757_v8, %v2757_v8  ;;  %v2396_v10 = vsel %vm1997_vm3, %v2757_v8, 0.0 }
 0x1c6   : > { %2343 = vst.msk [vmem:[%s4149_s22 + $0xa0] sm:$0xff] %vm1997_vm3, %v2264_v21  ;;  %v2394_v43 = vsel %vm1997_vm3, %v2264_v21, 0.0  ;;  %v2444_v19 = vmul.f32 %v2264_v21, %v2264_v21 }
 0x1c7   : > { %v2395_v36 = vadd.f32 %v2394_v43, %v2393_v37  ;;  %v2497_v0 = vsel %vm1997_vm3, %v2445_v16, 0.0 }
 0x1c8   : > { %v2495_v42 = vsel %vm1997_vm3, %v2444_v19, 0.0 }
 0x1c9   : > { %v2496_v30 = vadd.f32 %v2495_v42, %v2494_v54  ;;  %v2397_v6 = vadd.f32 %v2396_v10, %v2395_v36 }
 0x1cb   : > { %v2498_v17 = vadd.f32 %v2497_v0, %v2496_v30 }
 0x1d6   : > { %v2760_v20 = vpop.f32.mrb[6].mxu1 }
 0x1d7   : > { %2346 = vst.msk [vmem:[%s4149_s22 + $0xb8] sm:$0xff] %vm1997_vm3, %v2760_v20  ;;  %v2274_v24 = vpop.f32.mrb[7].mxu1  ;;  %v2447_v22 = vmul.f32 %v2760_v20, %v2760_v20  ;;  %v2400_v48 = vsel %vm1997_vm3, %v2760_v20, 0.0 }
 0x1d8   : > { %2345 = vst.msk [vmem:[%s4149_s22 + $0xb0] sm:$0xff] %vm1997_vm3, %v2274_v24  ;;  %v2398_v2 = vsel %vm1997_vm3, %v2274_v24, 0.0  ;;  %v2446_v3 = vmul.f32 %v2274_v24, %v2274_v24 }
 0x1d9   : > { %v2399_v44 = vadd.f32 %v2398_v2, %v2397_v6  ;;  %v2501_v11 = vsel %vm1997_vm3, %v2447_v22, 0.0 }
 0x1da   : > { %v2499_v5 = vsel %vm1997_vm3, %v2446_v3, 0.0 }
 0x1db   : > { %v2500_v33 = vadd.f32 %v2499_v5, %v2498_v17  ;;  %v2401_v25 = vadd.f32 %v2400_v48, %v2399_v44 }
 0x1dd   : > { %v2502_v7 = vadd.f32 %v2501_v11, %v2500_v33 }
 0x1e9   : > { %v2763_v1 = vpop.f32.mrb[8].mxu1 }
 0x1ea   : > { %2348 = vst.msk [vmem:[%s4149_s22 + $0xc8] sm:$0xff] %vm1997_vm3, %v2763_v1  ;;  %v2284_v34 = vpop.f32.mrb[9].mxu1  ;;  %v2449_v14 = vmul.f32 %v2763_v1, %v2763_v1  ;;  %v2404_v32 = vsel %vm1997_vm3, %v2763_v1, 0.0 }
 0x1eb   : > { %2347 = vst.msk [vmem:[%s4149_s22 + $0xc0] sm:$0xff] %vm1997_vm3, %v2284_v34  ;;  %v2402_v38 = vsel %vm1997_vm3, %v2284_v34, 0.0  ;;  %v2448_v39 = vmul.f32 %v2284_v34, %v2284_v34 }
 0x1ec   : > { %v2403_v51 = vadd.f32 %v2402_v38, %v2401_v25  ;;  %v2505_v62 = vsel %vm1997_vm3, %v2449_v14, 0.0 }
 0x1ed   : > { %v2503_v29 = vsel %vm1997_vm3, %v2448_v39, 0.0 }
 0x1ee   : > { %v2504_v13 = vadd.f32 %v2503_v29, %v2502_v7  ;;  %v2405_v31 = vadd.f32 %v2404_v32, %v2403_v51 }
 0x1f0   : > { %v2506_v55 = vadd.f32 %v2505_v62, %v2504_v13 }
 0x1fb   : > { %v2766_v60 = vpop.f32.mrb[10].mxu1 }
 0x1fc   : > { %2350 = vst.msk [vmem:[%s4149_s22 + $0xd8] sm:$0xff] %vm1997_vm3, %v2766_v60  ;;  %v2294_v45 = vpop.f32.mrb[11].mxu1  ;;  %v2451_v57 = vmul.f32 %v2766_v60, %v2766_v60  ;;  %v2408_v27 = vsel %vm1997_vm3, %v2766_v60, 0.0 }
 0x1fd   : > { %2349 = vst.msk [vmem:[%s4149_s22 + $0xd0] sm:$0xff] %vm1997_vm3, %v2294_v45  ;;  %v2406_v46 = vsel %vm1997_vm3, %v2294_v45, 0.0  ;;  %v2450_v23 = vmul.f32 %v2294_v45, %v2294_v45 }
 0x1fe   : > { %v2407_v15 = vadd.f32 %v2406_v46, %v2405_v31  ;;  %v2509_v61 = vsel %vm1997_vm3, %v2451_v57, 0.0 }
 0x1ff   : > { %v2507_v4 = vsel %vm1997_vm3, %v2450_v23, 0.0 }
 0x200   : > { %v2508_v35 = vadd.f32 %v2507_v4, %v2506_v55  ;;  %v2409_v12 = vadd.f32 %v2408_v27, %v2407_v15 }
 0x202   : > { %v2510_v49 = vadd.f32 %v2509_v61, %v2508_v35 }
 0x20d   : > { %v2769_v59 = vpop.f32.mrb[12].mxu1 }
 0x20e   : > { %2352 = vst.msk [vmem:[%s4149_s22 + $0xe8] sm:$0xff] %vm1997_vm3, %v2769_v59  ;;  %v2304_v18 = vpop.f32.mrb[13].mxu1  ;;  %v2453_v53 = vmul.f32 %v2769_v59, %v2769_v59  ;;  %v2412_v47 = vsel %vm1997_vm3, %v2769_v59, 0.0 }
 0x20f   : > { %2351 = vst.msk [vmem:[%s4149_s22 + $0xe0] sm:$0xff] %vm1997_vm3, %v2304_v18  ;;  %v2410_v52 = vsel %vm1997_vm3, %v2304_v18, 0.0  ;;  %v2452_v28 = vmul.f32 %v2304_v18, %v2304_v18 }
 0x210   : > { %v2411_v50 = vadd.f32 %v2410_v52, %v2409_v12  ;;  %v2513_v56 = vsel %vm1997_vm3, %v2453_v53, 0.0 }
 0x211   : > { %v2511_v63 = vsel %vm1997_vm3, %v2452_v28, 0.0 }
 0x212   : > { %v2512_v26 = vadd.f32 %v2511_v63, %v2510_v49  ;;  %v2413_v58 = vadd.f32 %v2412_v47, %v2411_v50 }
 0x214   : > { %v2514_v40 = vadd.f32 %v2513_v56, %v2512_v26 }
 0x21f   : > { %v2772_v41 = vpop.f32.mrb[14].mxu1 }
 0x220   : > { %2354 = vst.msk [vmem:[%s4149_s22 + $0xf8] sm:$0xff] %vm1997_vm3, %v2772_v41  ;;  %v2314_v37 = vpop.f32.mrb[15].mxu1  ;;  %v2455_v9 = vmul.f32 %v2772_v41, %v2772_v41  ;;  %v2416_v16 = vsel %vm1997_vm3, %v2772_v41, 0.0 }
 0x221   : > { %2353 = vst.msk [vmem:[%s4149_s22 + $0xf0] sm:$0xff] %vm1997_vm3, %v2314_v37  ;;  %v2414_v54 = vsel %vm1997_vm3, %v2314_v37, 0.0  ;;  %v2454_v8 = vmul.f32 %v2314_v37, %v2314_v37  ;;  %s2639_s22 = sshll.u32 %s196_s7, 1 }
 0x222   : > { %v2415_v21 = vadd.f32 %v2414_v54, %v2413_v58  ;;  %v2517_v10 = vsel %vm1997_vm3, %v2455_v9, 0.0  ;;  %s198_s5 = scalar_lea.vmem [#allocation2], %s2639_s22 }
 0x223   : > { %v2515_v43 = vsel %vm1997_vm3, %v2454_v8, 0.0  ;;  %s2551_s6 = sshll.u32 %s198_s5, 4  ;;  %s4607_s6 = int_to_ptr.vmem [resolvable:$true] %s2551_s6 }
 0x224   : > { %v2417_v19 = vadd.f32 %v2416_v16, %v2415_v21  ;;  %v2516_v36 = vadd.f32 %v2515_v43, %v2514_v40  ;;  %s2833_s19 = scalar_lea.vmem %s4607_s6, 32  ;;  %p2840_p0 = scmp.lt.s32.totalorder %s4607_s6, %s2838_s13 }
 0x225   : > { %p2834_p11 = scmp.ne.s32.totalorder %s4607_s6, %s2833_s19  ;;  %p2841_p1 = scmp.lt.s32.totalorder %s2839_s14, %s2833_s19 }
 0x226   : > { %v2418_v42 = vrot.slane %v2417_v19, 4  ;;  %v2518_v30 = vadd.f32 %v2517_v10, %v2516_v36 }
 0x227   : > { %p2835_p12 = pnand %p2834_p11, %p2961_p5  ;;  %p2842_p2 = por %p2841_p1, %p2840_p0 }
 0x228   : > { %v2419_v6 = vadd.f32 %v2418_v42, %v2417_v19  ;;  %v2519_v0 = vrot.slane %v2518_v30, 4 }
 0x229   : > { %p2836_p13 = pneg %p2835_p12 }
 0x22a   : > { %v2420_v17 = vrot.slane %v2419_v6, 2  ;;  %v2520_v20 = vadd.f32 %v2519_v0, %v2518_v30 }
 0x22b   : > { %p2843_p3 = pnand %p2842_p2, %p2836_p13 }
 0x22c   : > { %v2421_v24 = vadd.f32 %v2420_v17, %v2419_v6  ;;  %v2521_v22 = vrot.slane %v2520_v20, 2 }
 0x22e   : > { %v2422_v2 = vrot.slane %v2421_v24, 1  ;;  %v2522_v3 = vadd.f32 %v2521_v22, %v2520_v20 }
 0x230   : > { %v2523_v44 = vrot.slane %v2522_v3, 1  ;;  %v2423_v48 = vadd.f32 %v2422_v2, %v2421_v24 }
 0x232   : > { %v2524_v5 = vadd.f32 %v2523_v44, %v2522_v3 }
 0x234   : > { %v2526_v33 = vsel %vm2525_vm4, %v2423_v48, %v2524_v5 }
 0x235   : > { %2528 = vst.msk [vmem:[%s198_s5] sm:$0x3] %vm2527_vm5, %v2526_v33 }
 0x236   : > { %2846 = shalt.err (!%p2843_p3)
}
 0x237   : > { %s2847_s29 = scalar_lea.hbm %s4605_s10, 32  ;;  %s2851_s27 = scalar_lea.hbm %s4651_s4, 64 }
 0x238   : > { %p2848_p4 = scmp.ne.s32.totalorder %s4605_s10, %s2847_s29  ;;  %p2852_p9 = scmp.lt.u32.totalorder %s4605_s10, %s4651_s4 }
 0x239   : > { %p2853_p10 = scmp.lt.u32.totalorder %s2851_s27, %s2847_s29  ;;  %p2855_p12 = scmp.lt.u32.totalorder %s2847_s29, %s4605_s10 }
 0x23a   : > { %p2849_p7 = pnand %p2848_p4, %p2961_p5 }
 0x23b   : > { %p2854_p11 = por %p2853_p10, %p2852_p9 }
 0x23c   : > { %p2850_p8 = pneg %p2849_p7 }
 0x23d   : > { %p2856_p13 = por %p2855_p12, %p2854_p11 }
 0x23f   : > { %p2857_p0 = pnand %p2856_p13, %p2850_p8 }
 0x241   : > { %2860 = shalt.err (!%p2857_p0)
}
 0x242   : > { %2776 = dma.vmem_to_hbm [thread:$0]  (%p2961_p5), %s4607_s6, 32, %s4605_s10, %s2535_s11  }
 0x243 PF: > { %p2782_p1 = scmp.ge.s32.totalorder %s2895_s18, 2  ;;  %s2571_s22 = sand.u32 1, %s2883_s15  }
 0x244   : > { %s2572_s30 = scalar_lea.sflag [#allocation3], %s2571_s22 }
 0x245   : > { %p2779_p2 = pnand %p2782_p1, %p2965_p6 }
 0x247   : > { %2878 = dma.done.wait (!%p2779_p2), %s2572_s30, 32  }
 0x248   : > { %2880 = vsyncadd (!%p2779_p2), %s2572_s30, 4294967264  ;;  %p15_p3 = scmp.ge.s32.totalorder %s2948_s21, 4   ;;  %s4654_s15 = smov %s2887_s16 }
 0x249   : > { %s4655_s16 = smov %s2891_s17  ;;  %s4656_s17 = smov %s2959_s24 }
 0x24a   : > { %s4657_s18 = smov %s2948_s21  ;;  %17 = sbr.rel (!%p15_p3) target bundleno = 3 (0x3), region = 79 }
 0x251   :  { %2577 = vsyncpa [#allocation3], 1 }
 0x252   :  { %2579 = vsyncpa [#allocation3 + $0x1], 1 }

</bundles_post_ra>
